<compile_context>
chip_gen: v5e
topology: v5e:2x2
jax: 0.10.0
libtpu: 0.0.40
codegen_flags: <defaults>
</compile_context>

<pallas_src>
import math

import numpy as np
import jax
import jax.numpy as jnp
from jax import lax
from jax.experimental import pallas as pl
from jax.experimental.pallas import tpu as pltpu

CONST_SCALE = 0.18215
NUM_TRAIN_TIMESTEPS = 1000
PATCH = 8                   # VAE spatial down-sampling factor
LATENT_C = 4                # VAE latent channels
UNET_HIDDEN = 32
TEXT_EMBED = 32
TIME_FEAT = 8


# ----------------------------------------------------------------------------
# Scheduler constants (DDIM, CompVis/stable-diffusion-v1-4 config:
# scaled_linear betas, beta_start=0.00085, beta_end=0.012, steps_offset=1,
# set_alpha_to_one=False, clip_sample=False, prediction_type="epsilon").
# ----------------------------------------------------------------------------
def make_alphas_cumprod():
    beta_start, beta_end = 0.00085, 0.012
    betas = np.linspace(beta_start ** 0.5, beta_end ** 0.5,
                        NUM_TRAIN_TIMESTEPS, dtype=np.float64) ** 2
    alphas = 1.0 - betas
    return np.cumprod(alphas)


ALPHAS_CUMPROD = make_alphas_cumprod()


# ----------------------------------------------------------------------------
# Fused Pallas kernel: encode + all diffusion steps + decode + composite.
# All tensors are (features, pixels); the pixel axis (npix, multiple of 128)
# sits on lanes so stores are unmasked and matmul N is wide.
# ----------------------------------------------------------------------------
def make_fused_kernel(npix, steps):
    H = UNET_HIDDEN

    def kernel(scal_ref, pic_ref, encWT_ref, encb_ref, noise_ref,
               w1latT_ref, w1condT_ref, bias_ref, w2T_ref, b2_ref,
               decWT_ref, decb_ref, mask_ref, out_ref, h_scr):
        # -------- encode: both images in one N = 2*npix MXU pass ------------
        pic = pic_ref[...]                                   # (192, 2*npix)
        x = 2.0 * pic - 1.0
        m = jnp.dot(encWT_ref[...], x,
                    preferred_element_type=jnp.float32) + encb_ref[...]  # (8, 2*npix)
        mean_img = m[:LATENT_C, :npix]
        logvar_img = m[LATENT_C:, :npix]
        mean_cond = m[:LATENT_C, npix:]                      # posterior .mode()

        nz = noise_ref[...]                                  # (8, npix)
        sa0 = scal_ref[0]                                    # sqrt(alpha_t0)
        sb0 = scal_ref[1]                                    # sqrt(1 - alpha_t0)
        gs = scal_ref[2]                                     # guidance_scale
        igs = scal_ref[3]                                    # image_guidance_scale

        # posterior sample * CONST_SCALE, then scheduler.add_noise
        sampled = (mean_img + jnp.exp(0.5 * logvar_img) * nz[:LATENT_C, :]) * CONST_SCALE
        lat = sa0 * sampled + sb0 * nz[LATENT_C:, :]         # (4, npix)

        # cond-branch first-layer partial product: constant across steps
        base_cond = jnp.dot(w1condT_ref[...], mean_cond,
                            preferred_element_type=jnp.float32)         # (H, npix)

        w1latT = w1latT_ref[...]                             # (H, 4)
        w2T = w2T_ref[...]                                   # (4, H)
        b2 = b2_ref[...]                                     # (4, 1)

        # -------- diffusion steps (latents stay in vregs/VMEM) --------------
        for s in range(steps):                               # steps is static
            bias = bias_ref[s]                               # (3*H, npix) lane-dense
            base_lat = jnp.dot(w1latT, lat,
                               preferred_element_type=jnp.float32)      # (H, npix)

            # lane-stack the 3 CFG branches -> one (4,H)@(H,3*npix) matmul
            h_scr[:, 0:npix] = base_lat + base_cond + bias[0:H, :]          # text
            h_scr[:, npix:2 * npix] = base_lat + base_cond + bias[H:2 * H, :]  # image
            h_scr[:, 2 * npix:3 * npix] = base_lat + bias[2 * H:3 * H, :]      # uncond
            h_all = jnp.maximum(h_scr[...], 0.0)             # (H, 3*npix)
            eps = jnp.dot(w2T, h_all,
                          preferred_element_type=jnp.float32) + b2       # (4, 3*npix)

            eps_text = eps[:, 0:npix]
            eps_image = eps[:, npix:2 * npix]
            eps_uncond = eps[:, 2 * npix:3 * npix]

            # classifier-free guidance
            noise_pred = (eps_uncond
                          + gs * (eps_text - eps_image)
                          + igs * (eps_image - eps_uncond))

            # DDIM step (eta=0, epsilon prediction); scalars from SMEM table
            base = 4 + 4 * s
            inv_sa_t = scal_ref[base + 0]                    # 1/sqrt(alpha_t)
            sb_t = scal_ref[base + 1]                        # sqrt(1-alpha_t)
            sa_p = scal_ref[base + 2]                        # sqrt(alpha_prev)
            sb_p = scal_ref[base + 3]                        # sqrt(1-alpha_prev)
            pred_x0 = (lat - sb_t * noise_pred) * inv_sa_t
            lat = sa_p * pred_x0 + sb_p * noise_pred

        # -------- decode + /2+0.5 clamp + mask composite ---------------------
        dec = jnp.dot(decWT_ref[...], lat * (1.0 / CONST_SCALE),
                      preferred_element_type=jnp.float32) + decb_ref[...]  # (192, npix)
        img = jnp.clip(dec * 0.5 + 0.5, 0.0, 1.0)
        mk = mask_ref[...]
        out_ref[...] = img * mk + pic[:, npix:] * (1.0 - mk)

    return kernel


def _vmem():
    return pl.BlockSpec(memory_space=pltpu.MemorySpace.VMEM)


def _smem():
    return pl.BlockSpec(memory_space=pltpu.MemorySpace.SMEM)


def fused_edit_pallas(scalars, p_imgcond, encWT, encb, noise, w1latT, w1condT,
                      bias_dense, w2T, b2, decWT, decb, p_mask):
    npix = p_mask.shape[1]
    steps = bias_dense.shape[0]
    kernel = make_fused_kernel(npix, steps)
    return pl.pallas_call(
        kernel,
        out_shape=jax.ShapeDtypeStruct((3 * PATCH * PATCH, npix), jnp.float32),
        in_specs=[_smem()] + [_vmem()] * 12,
        out_specs=_vmem(),
        scratch_shapes=[pltpu.VMEM((UNET_HIDDEN, 3 * npix), jnp.float32)],
    )(scalars, p_imgcond, encWT, encb, noise, w1latT, w1condT,
      bias_dense, w2T, b2, decWT, decb, p_mask)


# ----------------------------------------------------------------------------
# Synthetic parameter construction (deterministic) — stands in for the
# diffusers pipeline weights. Stored pre-transposed for the (features, pixels)
# kernel layouts.
# ----------------------------------------------------------------------------
def init_params(key):
    ks = jax.random.split(key, 6)
    s = 0.1
    enc_W = s * jax.random.normal(ks[0], (3 * PATCH * PATCH, 2 * LATENT_C), jnp.float32)
    dec_W = s * jax.random.normal(ks[1], (LATENT_C, 3 * PATCH * PATCH), jnp.float32)
    unet_W1 = s * jax.random.normal(ks[2], (2 * LATENT_C, UNET_HIDDEN), jnp.float32)
    unet_W2 = s * jax.random.normal(ks[3], (UNET_HIDDEN, LATENT_C), jnp.float32)
    unet_Wt = s * jax.random.normal(ks[4], (TEXT_EMBED, UNET_HIDDEN), jnp.float32)
    unet_Wtt = s * jax.random.normal(ks[5], (TIME_FEAT, UNET_HIDDEN), jnp.float32)
    return {
        # VAE encoder: pixel patch (3*P*P) -> (mean 4 + logvar 4), transposed
        "encWT": jnp.asarray(enc_W.T),                               # (8, 192)
        "encb_col": jnp.zeros((2 * LATENT_C, 1), jnp.float32),
        # VAE decoder: latent 4 -> pixel patch (3*P*P), transposed
        "decWT": jnp.asarray(dec_W.T),                               # (192, 4)
        "decb_col": jnp.zeros((3 * PATCH * PATCH, 1), jnp.float32),
        # UNet per-pixel MLP, split by input block and transposed
        "unet_W1latT": jnp.asarray(unet_W1[:LATENT_C, :].T),         # (32, 4)
        "unet_W1condT": jnp.asarray(unet_W1[LATENT_C:, :].T),        # (32, 4)
        "unet_b1": jnp.zeros((UNET_HIDDEN,), jnp.float32),
        "unet_W2T": jnp.asarray(unet_W2.T),                          # (4, 32)
        "unet_b2col": jnp.zeros((LATENT_C, 1), jnp.float32),
        # conditioning projections (tiny, applied at JAX level inside jit)
        "unet_Wt": unet_Wt,
        "unet_Wtt": unet_Wtt,
    }


# ----------------------------------------------------------------------------
# Glue: channels-first patchification -> (features, pixels) with pixels on lanes
# ----------------------------------------------------------------------------
def patchify_cf(imgs):
    # (B, C, H, W) -> (C*P*P, B*Hp*Wp)
    B, C, H, W = imgs.shape
    Hp, Wp = H // PATCH, W // PATCH
    x = imgs.reshape(B, C, Hp, PATCH, Wp, PATCH)
    x = x.transpose(1, 3, 5, 0, 2, 4)            # (C, ph, pw, B, Hp, Wp)
    return x.reshape(C * PATCH * PATCH, B * Hp * Wp), (B, Hp, Wp)


def unpatchify_cf(rows, shape_info, C=3):
    # (C*P*P, B*Hp*Wp) -> (B, C, H, W)
    B, Hp, Wp = shape_info
    x = rows.reshape(C, PATCH, PATCH, B, Hp, Wp)
    x = x.transpose(3, 0, 4, 1, 5, 2)            # (B, C, Hp, ph, Wp, pw)
    return x.reshape(B, C, Hp * PATCH, Wp * PATCH)


# ----------------------------------------------------------------------------
# jitted tensor path: patchify, bias table, ONE fused pallas_call, unpatchify.
# Everything T-dependent arrives as small arrays (scalars / t_feats) so a new
# T does NOT retrace or recompile anything.
# ----------------------------------------------------------------------------
@jax.jit
def _edit_image_core(params, image, image_cond, img_mask, text_embeddings,
                     noise_key, scalars, t_feats):
    B, _, Himg, Wimg = image.shape
    Hp, Wp = Himg // PATCH, Wimg // PATCH
    pix_per_img = Hp * Wp
    npix = B * pix_per_img
    steps = t_feats.shape[0]

    p_img, shape_info = patchify_cf(image)                   # (192, npix)
    p_cond, _ = patchify_cf(image_cond)                      # (192, npix)
    p_imgcond = jnp.concatenate([p_img, p_cond], axis=1)     # (192, 2*npix)

    mask3 = jnp.broadcast_to(img_mask, image_cond.shape)
    p_mask, _ = patchify_cf(mask3)                           # (192, npix)

    # posterior noise (rows 0..3) and add_noise noise (rows 4..7), one tile
    noise = jax.random.normal(noise_key, (2 * LATENT_C, npix), jnp.float32)

    # UNet conditioning bias table: (steps, 3*H, npix), lane-dense.
    pooled = text_embeddings.mean(axis=1)                            # (3B, E)
    bias_static = pooled @ params["unet_Wt"] + params["unet_b1"]     # (3B, H)
    bias_time = t_feats @ params["unet_Wtt"]                         # (steps, H)
    bias_batch = bias_static[None, :, :] + bias_time[:, None, :]     # (steps, 3B, H)
    bias_batch = bias_batch.reshape(steps, 3, B, UNET_HIDDEN).transpose(0, 1, 3, 2)
    bias_dense = jnp.broadcast_to(
        bias_batch[..., None],
        (steps, 3, UNET_HIDDEN, B, pix_per_img),
    ).reshape(steps, 3 * UNET_HIDDEN, npix).astype(jnp.float32)

    out_rows = fused_edit_pallas(
        scalars, p_imgcond, params["encWT"], params["encb_col"], noise,
        params["unet_W1latT"], params["unet_W1condT"], bias_dense,
        params["unet_W2T"], params["unet_b2col"],
        params["decWT"], params["decb_col"], p_mask)

    return unpatchify_cf(out_rows, shape_info, C=3)


# ----------------------------------------------------------------------------
# edit_image: full forward path of InstructPix2Pix.edit_image
# ----------------------------------------------------------------------------
def edit_image(params, key, text_embeddings, image, image_cond, img_mask,
               guidance_scale=7.5, image_guidance_scale=1.5,
               diffusion_steps=4, lower_bound=0.7, upper_bound=0.98,
               t_seed=0):
    min_step = int(NUM_TRAIN_TIMESTEPS * lower_bound)
    max_step = int(NUM_TRAIN_TIMESTEPS * upper_bound)

    # host-side RNG for T (avoids device->host sync / retrace churn)
    T = int(np.random.default_rng(t_seed).integers(min_step, max_step + 1))

    # DDIM set_timesteps with config.num_train_timesteps overwritten to T
    # ("leading" spacing, steps_offset=1).
    step_ratio = T // diffusion_steps
    timesteps = ((np.arange(0, diffusion_steps) * step_ratio)
                 .round()[::-1].astype(np.int64) + 1)

    # per-call scalar table (SMEM operand; values change with T, shape doesn't)
    scal = np.zeros(4 + 4 * diffusion_steps, np.float32)
    a0 = float(ALPHAS_CUMPROD[int(timesteps[0])])
    scal[0] = math.sqrt(a0)
    scal[1] = math.sqrt(1.0 - a0)
    scal[2] = float(guidance_scale)
    scal[3] = float(image_guidance_scale)
    for i, t in enumerate(timesteps):
        t = int(t)
        prev_t = t - step_ratio
        a_t = float(ALPHAS_CUMPROD[t])
        a_prev = float(ALPHAS_CUMPROD[prev_t]) if prev_t >= 0 else float(ALPHAS_CUMPROD[0])
        scal[4 + 4 * i + 0] = 1.0 / math.sqrt(a_t)
        scal[4 + 4 * i + 1] = math.sqrt(1.0 - a_t)
        scal[4 + 4 * i + 2] = math.sqrt(a_prev)
        scal[4 + 4 * i + 3] = math.sqrt(1.0 - a_prev)

    # per-step timestep features for the synthetic UNet conditioning
    freqs = np.array([1.0, 0.1, 0.01, 0.001], dtype=np.float32)
    t_feats = np.stack(
        [np.concatenate([np.sin(float(t) * freqs), np.cos(float(t) * freqs)])
         for t in timesteps]).astype(np.float32)             # (steps, TIME_FEAT)

    return _edit_image_core(params, image, image_cond, img_mask, text_embeddings,
                            key, jnp.asarray(scal), jnp.asarray(t_feats))


# ----------------------------------------------------------------------------
if __name__ == "__main__":
    key = jax.random.PRNGKey(0)
    k_params, k_img, k_cond, k_mask, k_text, k_run = jax.random.split(key, 6)

    BS, H, W = 2, 64, 64          # latent grid: 8x8 -> 128 latent pixels (lanes)
    SEQ = 8

    params = init_params(k_params)

    image = jax.random.uniform(k_img, (BS, 3, H, W), jnp.float32)
    image_cond = jax.random.uniform(k_cond, (BS, 3, H, W), jnp.float32)
    img_mask = (jax.random.uniform(k_mask, (BS, 1, H, W)) > 0.5).astype(jnp.float32)
    text_embeddings = jax.random.normal(k_text, (3 * BS, SEQ, TEXT_EMBED), jnp.float32)

    edited = edit_image(params, k_run, text_embeddings, image, image_cond,
                        img_mask, guidance_scale=7.5, image_guidance_scale=1.5,
                        diffusion_steps=4)
    edited = jax.block_until_ready(edited)
    assert edited.shape == (BS, 3, H, W)
    assert bool(jnp.isfinite(edited).all())
    print("KERNEL_OK")
</pallas_src>

<mosaic_0001>
module attributes {stable_mosaic.version = 11 : i64} {
  func.func @kernel(%arg0: memref<20xf32, #tpu.memory_space<smem>>, %arg1: memref<192x256xf32, #tpu.memory_space<vmem>>, %arg2: memref<8x192xf32, #tpu.memory_space<vmem>>, %arg3: memref<8x1xf32, #tpu.memory_space<vmem>>, %arg4: memref<8x128xf32, #tpu.memory_space<vmem>>, %arg5: memref<32x4xf32, #tpu.memory_space<vmem>>, %arg6: memref<32x4xf32, #tpu.memory_space<vmem>>, %arg7: memref<4x96x128xf32, #tpu.memory_space<vmem>>, %arg8: memref<4x32xf32, #tpu.memory_space<vmem>>, %arg9: memref<4x1xf32, #tpu.memory_space<vmem>>, %arg10: memref<192x4xf32, #tpu.memory_space<vmem>>, %arg11: memref<192x1xf32, #tpu.memory_space<vmem>>, %arg12: memref<192x128xf32, #tpu.memory_space<vmem>>, %arg13: memref<192x128xf32, #tpu.memory_space<vmem>>, %arg14: memref<32x384xf32, #tpu.memory_space<vmem>>) attributes {dimension_semantics = [], scalar_prefetch = 0 : i64, scratch_operands = 1 : i64, tpu.core_type = #tpu.core_type<tc>} {
    %c0 = arith.constant 0 : index
    %c0_0 = arith.constant 0 : index
    %0 = vector.load %arg1[%c0, %c0_0] : memref<192x256xf32, #tpu.memory_space<vmem>>, vector<192x256xf32>
    %cst = arith.constant 2.000000e+00 : f32
    %1 = vector.broadcast %cst : f32 to vector<192x256xf32>
    %2 = arith.mulf %1, %0 : vector<192x256xf32>
    %cst_1 = arith.constant 1.000000e+00 : f32
    %3 = vector.broadcast %cst_1 : f32 to vector<192x256xf32>
    %4 = arith.subf %2, %3 : vector<192x256xf32>
    %c0_2 = arith.constant 0 : index
    %c0_3 = arith.constant 0 : index
    %5 = vector.load %arg2[%c0_2, %c0_3] : memref<8x192xf32, #tpu.memory_space<vmem>>, vector<8x192xf32>
    %cst_4 = arith.constant dense<0.000000e+00> : vector<8x256xf32>
    %6 = tpu.matmul %5, %4, %cst_4 {dimension_numbers = #tpu.dot_dimension_numbers<[1], [0], [0], [1], [0, 0, 1, 1], [], []>} : vector<8x192xf32>, vector<192x256xf32>, vector<8x256xf32> -> vector<8x256xf32>
    %c0_5 = arith.constant 0 : index
    %c0_6 = arith.constant 0 : index
    %7 = vector.load %arg3[%c0_5, %c0_6] : memref<8x1xf32, #tpu.memory_space<vmem>>, vector<8x1xf32>
    %8 = vector.broadcast %7 : vector<8x1xf32> to vector<8x256xf32>
    %9 = arith.addf %6, %8 : vector<8x256xf32>
    %10 = vector.extract_strided_slice %9 {offsets = [0, 0], sizes = [4, 128], strides = [1, 1]} : vector<8x256xf32> to vector<4x128xf32>
    %11 = vector.extract_strided_slice %9 {offsets = [4, 0], sizes = [4, 128], strides = [1, 1]} : vector<8x256xf32> to vector<4x128xf32>
    %12 = vector.extract_strided_slice %9 {offsets = [0, 128], sizes = [4, 128], strides = [1, 1]} : vector<8x256xf32> to vector<4x128xf32>
    %c0_7 = arith.constant 0 : index
    %c0_8 = arith.constant 0 : index
    %13 = vector.load %arg4[%c0_7, %c0_8] : memref<8x128xf32, #tpu.memory_space<vmem>>, vector<8x128xf32>
    %c0_9 = arith.constant 0 : index
    %14 = memref.load %arg0[%c0_9] : memref<20xf32, #tpu.memory_space<smem>>
    %c1 = arith.constant 1 : index
    %15 = memref.load %arg0[%c1] : memref<20xf32, #tpu.memory_space<smem>>
    %c2 = arith.constant 2 : index
    %16 = memref.load %arg0[%c2] : memref<20xf32, #tpu.memory_space<smem>>
    %c3 = arith.constant 3 : index
    %17 = memref.load %arg0[%c3] : memref<20xf32, #tpu.memory_space<smem>>
    %cst_10 = arith.constant 5.000000e-01 : f32
    %18 = vector.broadcast %cst_10 : f32 to vector<4x128xf32>
    %19 = arith.mulf %18, %11 : vector<4x128xf32>
    %20 = math.exp %19 : vector<4x128xf32>
    %21 = vector.extract_strided_slice %13 {offsets = [0, 0], sizes = [4, 128], strides = [1, 1]} : vector<8x128xf32> to vector<4x128xf32>
    %22 = arith.mulf %20, %21 : vector<4x128xf32>
    %23 = arith.addf %10, %22 : vector<4x128xf32>
    %cst_11 = arith.constant 1.821500e-01 : f32
    %24 = vector.broadcast %cst_11 : f32 to vector<4x128xf32>
    %25 = arith.mulf %23, %24 : vector<4x128xf32>
    %26 = vector.broadcast %14 : f32 to vector<4x128xf32>
    %27 = arith.mulf %26, %25 : vector<4x128xf32>
    %28 = vector.extract_strided_slice %13 {offsets = [4, 0], sizes = [4, 128], strides = [1, 1]} : vector<8x128xf32> to vector<4x128xf32>
    %29 = vector.broadcast %15 : f32 to vector<4x128xf32>
    %30 = arith.mulf %29, %28 : vector<4x128xf32>
    %31 = arith.addf %27, %30 : vector<4x128xf32>
    %c0_12 = arith.constant 0 : index
    %c0_13 = arith.constant 0 : index
    %32 = vector.load %arg6[%c0_12, %c0_13] : memref<32x4xf32, #tpu.memory_space<vmem>>, vector<32x4xf32>
    %cst_14 = arith.constant dense<0.000000e+00> : vector<32x128xf32>
    %33 = tpu.matmul %32, %12, %cst_14 {dimension_numbers = #tpu.dot_dimension_numbers<[1], [0], [0], [1], [0, 0, 1, 1], [], []>} : vector<32x4xf32>, vector<4x128xf32>, vector<32x128xf32> -> vector<32x128xf32>
    %c0_15 = arith.constant 0 : index
    %c0_16 = arith.constant 0 : index
    %34 = vector.load %arg5[%c0_15, %c0_16] : memref<32x4xf32, #tpu.memory_space<vmem>>, vector<32x4xf32>
    %c0_17 = arith.constant 0 : index
    %c0_18 = arith.constant 0 : index
    %35 = vector.load %arg8[%c0_17, %c0_18] : memref<4x32xf32, #tpu.memory_space<vmem>>, vector<4x32xf32>
    %c0_19 = arith.constant 0 : index
    %c0_20 = arith.constant 0 : index
    %36 = vector.load %arg9[%c0_19, %c0_20] : memref<4x1xf32, #tpu.memory_space<vmem>>, vector<4x1xf32>
    %c0_21 = arith.constant 0 : index
    %c0_22 = arith.constant 0 : index
    %c0_23 = arith.constant 0 : index
    %37 = vector.load %arg7[%c0_21, %c0_22, %c0_23] : memref<4x96x128xf32, #tpu.memory_space<vmem>>, vector<1x96x128xf32>
    %38 = vector.shape_cast %37 : vector<1x96x128xf32> to vector<96x128xf32>
    %cst_24 = arith.constant dense<0.000000e+00> : vector<32x128xf32>
    %39 = tpu.matmul %34, %31, %cst_24 {dimension_numbers = #tpu.dot_dimension_numbers<[1], [0], [0], [1], [0, 0, 1, 1], [], []>} : vector<32x4xf32>, vector<4x128xf32>, vector<32x128xf32> -> vector<32x128xf32>
    %40 = arith.addf %39, %33 : vector<32x128xf32>
    %41 = vector.extract_strided_slice %38 {offsets = [0, 0], sizes = [32, 128], strides = [1, 1]} : vector<96x128xf32> to vector<32x128xf32>
    %42 = arith.addf %40, %41 : vector<32x128xf32>
    %c0_25 = arith.constant 0 : index
    %c0_26 = arith.constant 0 : index
    %43 = vector.load %arg14[%c0_25, %c0_26] : memref<32x384xf32, #tpu.memory_space<vmem>>, vector<32x128xf32>
    tpu.vector_store %arg14[%c0_25, %c0_26], %42 {strides = array<i32>} : memref<32x384xf32, #tpu.memory_space<vmem>>, vector<32x128xf32>,
    %44 = arith.addf %39, %33 : vector<32x128xf32>
    %45 = vector.extract_strided_slice %38 {offsets = [32, 0], sizes = [32, 128], strides = [1, 1]} : vector<96x128xf32> to vector<32x128xf32>
    %46 = arith.addf %44, %45 : vector<32x128xf32>
    %c0_27 = arith.constant 0 : index
    %c128 = arith.constant 128 : index
    %47 = vector.load %arg14[%c0_27, %c128] : memref<32x384xf32, #tpu.memory_space<vmem>>, vector<32x128xf32>
    tpu.vector_store %arg14[%c0_27, %c128], %46 {strides = array<i32>} : memref<32x384xf32, #tpu.memory_space<vmem>>, vector<32x128xf32>,
    %48 = vector.extract_strided_slice %38 {offsets = [64, 0], sizes = [32, 128], strides = [1, 1]} : vector<96x128xf32> to vector<32x128xf32>
    %49 = arith.addf %39, %48 : vector<32x128xf32>
    %c0_28 = arith.constant 0 : index
    %c256 = arith.constant 256 : index
    %50 = vector.load %arg14[%c0_28, %c256] : memref<32x384xf32, #tpu.memory_space<vmem>>, vector<32x128xf32>
    tpu.vector_store %arg14[%c0_28, %c256], %49 {strides = array<i32>} : memref<32x384xf32, #tpu.memory_space<vmem>>, vector<32x128xf32>,
    %c0_29 = arith.constant 0 : index
    %c0_30 = arith.constant 0 : index
    %51 = vector.load %arg14[%c0_29, %c0_30] : memref<32x384xf32, #tpu.memory_space<vmem>>, vector<32x384xf32>
    %cst_31 = arith.constant 0.000000e+00 : f32
    %52 = vector.broadcast %cst_31 : f32 to vector<32x384xf32>
    %53 = arith.maximumf %51, %52 : vector<32x384xf32>
    %cst_32 = arith.constant dense<0.000000e+00> : vector<4x384xf32>
    %54 = tpu.matmul %35, %53, %cst_32 {dimension_numbers = #tpu.dot_dimension_numbers<[1], [0], [0], [1], [0, 0, 1, 1], [], []>} : vector<4x32xf32>, vector<32x384xf32>, vector<4x384xf32> -> vector<4x384xf32>
    %55 = vector.broadcast %36 : vector<4x1xf32> to vector<4x384xf32>
    %56 = arith.addf %54, %55 : vector<4x384xf32>
    %57 = vector.extract_strided_slice %56 {offsets = [0, 0], sizes = [4, 128], strides = [1, 1]} : vector<4x384xf32> to vector<4x128xf32>
    %58 = vector.extract_strided_slice %56 {offsets = [0, 128], sizes = [4, 128], strides = [1, 1]} : vector<4x384xf32> to vector<4x128xf32>
    %59 = vector.extract_strided_slice %56 {offsets = [0, 256], sizes = [4, 128], strides = [1, 1]} : vector<4x384xf32> to vector<4x128xf32>
    %60 = arith.subf %57, %58 : vector<4x128xf32>
    %61 = vector.broadcast %16 : f32 to vector<4x128xf32>
    %62 = arith.mulf %61, %60 : vector<4x128xf32>
    %63 = arith.addf %59, %62 : vector<4x128xf32>
    %64 = arith.subf %58, %59 : vector<4x128xf32>
    %65 = vector.broadcast %17 : f32 to vector<4x128xf32>
    %66 = arith.mulf %65, %64 : vector<4x128xf32>
    %67 = arith.addf %63, %66 : vector<4x128xf32>
    %c4 = arith.constant 4 : index
    %68 = memref.load %arg0[%c4] : memref<20xf32, #tpu.memory_space<smem>>
    %c5 = arith.constant 5 : index
    %69 = memref.load %arg0[%c5] : memref<20xf32, #tpu.memory_space<smem>>
    %c6 = arith.constant 6 : index
    %70 = memref.load %arg0[%c6] : memref<20xf32, #tpu.memory_space<smem>>
    %c7 = arith.constant 7 : index
    %71 = memref.load %arg0[%c7] : memref<20xf32, #tpu.memory_space<smem>>
    %72 = vector.broadcast %69 : f32 to vector<4x128xf32>
    %73 = arith.mulf %72, %67 : vector<4x128xf32>
    %74 = arith.subf %31, %73 : vector<4x128xf32>
    %75 = vector.broadcast %68 : f32 to vector<4x128xf32>
    %76 = arith.mulf %74, %75 : vector<4x128xf32>
    %77 = vector.broadcast %70 : f32 to vector<4x128xf32>
    %78 = arith.mulf %77, %76 : vector<4x128xf32>
    %79 = vector.broadcast %71 : f32 to vector<4x128xf32>
    %80 = arith.mulf %79, %67 : vector<4x128xf32>
    %81 = arith.addf %78, %80 : vector<4x128xf32>
    %c1_33 = arith.constant 1 : index
    %c0_34 = arith.constant 0 : index
    %c0_35 = arith.constant 0 : index
    %82 = vector.load %arg7[%c1_33, %c0_34, %c0_35] : memref<4x96x128xf32, #tpu.memory_space<vmem>>, vector<1x96x128xf32>
    %83 = vector.shape_cast %82 : vector<1x96x128xf32> to vector<96x128xf32>
    %cst_36 = arith.constant dense<0.000000e+00> : vector<32x128xf32>
    %84 = tpu.matmul %34, %81, %cst_36 {dimension_numbers = #tpu.dot_dimension_numbers<[1], [0], [0], [1], [0, 0, 1, 1], [], []>} : vector<32x4xf32>, vector<4x128xf32>, vector<32x128xf32> -> vector<32x128xf32>
    %85 = arith.addf %84, %33 : vector<32x128xf32>
    %86 = vector.extract_strided_slice %83 {offsets = [0, 0], sizes = [32, 128], strides = [1, 1]} : vector<96x128xf32> to vector<32x128xf32>
    %87 = arith.addf %85, %86 : vector<32x128xf32>
    %c0_37 = arith.constant 0 : index
    %c0_38 = arith.constant 0 : index
    %88 = vector.load %arg14[%c0_37, %c0_38] : memref<32x384xf32, #tpu.memory_space<vmem>>, vector<32x128xf32>
    tpu.vector_store %arg14[%c0_37, %c0_38], %87 {strides = array<i32>} : memref<32x384xf32, #tpu.memory_space<vmem>>, vector<32x128xf32>,
    %89 = arith.addf %84, %33 : vector<32x128xf32>
    %90 = vector.extract_strided_slice %83 {offsets = [32, 0], sizes = [32, 128], strides = [1, 1]} : vector<96x128xf32> to vector<32x128xf32>
    %91 = arith.addf %89, %90 : vector<32x128xf32>
    %c0_39 = arith.constant 0 : index
    %c128_40 = arith.constant 128 : index
    %92 = vector.load %arg14[%c0_39, %c128_40] : memref<32x384xf32, #tpu.memory_space<vmem>>, vector<32x128xf32>
    tpu.vector_store %arg14[%c0_39, %c128_40], %91 {strides = array<i32>} : memref<32x384xf32, #tpu.memory_space<vmem>>, vector<32x128xf32>,
    %93 = vector.extract_strided_slice %83 {offsets = [64, 0], sizes = [32, 128], strides = [1, 1]} : vector<96x128xf32> to vector<32x128xf32>
    %94 = arith.addf %84, %93 : vector<32x128xf32>
    %c0_41 = arith.constant 0 : index
    %c256_42 = arith.constant 256 : index
    %95 = vector.load %arg14[%c0_41, %c256_42] : memref<32x384xf32, #tpu.memory_space<vmem>>, vector<32x128xf32>
    tpu.vector_store %arg14[%c0_41, %c256_42], %94 {strides = array<i32>} : memref<32x384xf32, #tpu.memory_space<vmem>>, vector<32x128xf32>,
    %c0_43 = arith.constant 0 : index
    %c0_44 = arith.constant 0 : index
    %96 = vector.load %arg14[%c0_43, %c0_44] : memref<32x384xf32, #tpu.memory_space<vmem>>, vector<32x384xf32>
    %cst_45 = arith.constant 0.000000e+00 : f32
    %97 = vector.broadcast %cst_45 : f32 to vector<32x384xf32>
    %98 = arith.maximumf %96, %97 : vector<32x384xf32>
    %cst_46 = arith.constant dense<0.000000e+00> : vector<4x384xf32>
    %99 = tpu.matmul %35, %98, %cst_46 {dimension_numbers = #tpu.dot_dimension_numbers<[1], [0], [0], [1], [0, 0, 1, 1], [], []>} : vector<4x32xf32>, vector<32x384xf32>, vector<4x384xf32> -> vector<4x384xf32>
    %100 = vector.broadcast %36 : vector<4x1xf32> to vector<4x384xf32>
    %101 = arith.addf %99, %100 : vector<4x384xf32>
    %102 = vector.extract_strided_slice %101 {offsets = [0, 0], sizes = [4, 128], strides = [1, 1]} : vector<4x384xf32> to vector<4x128xf32>
    %103 = vector.extract_strided_slice %101 {offsets = [0, 128], sizes = [4, 128], strides = [1, 1]} : vector<4x384xf32> to vector<4x128xf32>
    %104 = vector.extract_strided_slice %101 {offsets = [0, 256], sizes = [4, 128], strides = [1, 1]} : vector<4x384xf32> to vector<4x128xf32>
    %105 = arith.subf %102, %103 : vector<4x128xf32>
    %106 = vector.broadcast %16 : f32 to vector<4x128xf32>
    %107 = arith.mulf %106, %105 : vector<4x128xf32>
    %108 = arith.addf %104, %107 : vector<4x128xf32>
    %109 = arith.subf %103, %104 : vector<4x128xf32>
    %110 = vector.broadcast %17 : f32 to vector<4x128xf32>
    %111 = arith.mulf %110, %109 : vector<4x128xf32>
    %112 = arith.addf %108, %111 : vector<4x128xf32>
    %c8 = arith.constant 8 : index
    %113 = memref.load %arg0[%c8] : memref<20xf32, #tpu.memory_space<smem>>
    %c9 = arith.constant 9 : index
    %114 = memref.load %arg0[%c9] : memref<20xf32, #tpu.memory_space<smem>>
    %c10 = arith.constant 10 : index
    %115 = memref.load %arg0[%c10] : memref<20xf32, #tpu.memory_space<smem>>
    %c11 = arith.constant 11 : index
    %116 = memref.load %arg0[%c11] : memref<20xf32, #tpu.memory_space<smem>>
    %117 = vector.broadcast %114 : f32 to vector<4x128xf32>
    %118 = arith.mulf %117, %112 : vector<4x128xf32>
    %119 = arith.subf %81, %118 : vector<4x128xf32>
    %120 = vector.broadcast %113 : f32 to vector<4x128xf32>
    %121 = arith.mulf %119, %120 : vector<4x128xf32>
    %122 = vector.broadcast %115 : f32 to vector<4x128xf32>
    %123 = arith.mulf %122, %121 : vector<4x128xf32>
    %124 = vector.broadcast %116 : f32 to vector<4x128xf32>
    %125 = arith.mulf %124, %112 : vector<4x128xf32>
    %126 = arith.addf %123, %125 : vector<4x128xf32>
    %c2_47 = arith.constant 2 : index
    %c0_48 = arith.constant 0 : index
    %c0_49 = arith.constant 0 : index
    %127 = vector.load %arg7[%c2_47, %c0_48, %c0_49] : memref<4x96x128xf32, #tpu.memory_space<vmem>>, vector<1x96x128xf32>
    %128 = vector.shape_cast %127 : vector<1x96x128xf32> to vector<96x128xf32>
    %cst_50 = arith.constant dense<0.000000e+00> : vector<32x128xf32>
    %129 = tpu.matmul %34, %126, %cst_50 {dimension_numbers = #tpu.dot_dimension_numbers<[1], [0], [0], [1], [0, 0, 1, 1], [], []>} : vector<32x4xf32>, vector<4x128xf32>, vector<32x128xf32> -> vector<32x128xf32>
    %130 = arith.addf %129, %33 : vector<32x128xf32>
    %131 = vector.extract_strided_slice %128 {offsets = [0, 0], sizes = [32, 128], strides = [1, 1]} : vector<96x128xf32> to vector<32x128xf32>
    %132 = arith.addf %130, %131 : vector<32x128xf32>
    %c0_51 = arith.constant 0 : index
    %c0_52 = arith.constant 0 : index
    %133 = vector.load %arg14[%c0_51, %c0_52] : memref<32x384xf32, #tpu.memory_space<vmem>>, vector<32x128xf32>
    tpu.vector_store %arg14[%c0_51, %c0_52], %132 {strides = array<i32>} : memref<32x384xf32, #tpu.memory_space<vmem>>, vector<32x128xf32>,
    %134 = arith.addf %129, %33 : vector<32x128xf32>
    %135 = vector.extract_strided_slice %128 {offsets = [32, 0], sizes = [32, 128], strides = [1, 1]} : vector<96x128xf32> to vector<32x128xf32>
    %136 = arith.addf %134, %135 : vector<32x128xf32>
    %c0_53 = arith.constant 0 : index
    %c128_54 = arith.constant 128 : index
    %137 = vector.load %arg14[%c0_53, %c128_54] : memref<32x384xf32, #tpu.memory_space<vmem>>, vector<32x128xf32>
    tpu.vector_store %arg14[%c0_53, %c128_54], %136 {strides = array<i32>} : memref<32x384xf32, #tpu.memory_space<vmem>>, vector<32x128xf32>,
    %138 = vector.extract_strided_slice %128 {offsets = [64, 0], sizes = [32, 128], strides = [1, 1]} : vector<96x128xf32> to vector<32x128xf32>
    %139 = arith.addf %129, %138 : vector<32x128xf32>
    %c0_55 = arith.constant 0 : index
    %c256_56 = arith.constant 256 : index
    %140 = vector.load %arg14[%c0_55, %c256_56] : memref<32x384xf32, #tpu.memory_space<vmem>>, vector<32x128xf32>
    tpu.vector_store %arg14[%c0_55, %c256_56], %139 {strides = array<i32>} : memref<32x384xf32, #tpu.memory_space<vmem>>, vector<32x128xf32>,
    %c0_57 = arith.constant 0 : index
    %c0_58 = arith.constant 0 : index
    %141 = vector.load %arg14[%c0_57, %c0_58] : memref<32x384xf32, #tpu.memory_space<vmem>>, vector<32x384xf32>
    %cst_59 = arith.constant 0.000000e+00 : f32
    %142 = vector.broadcast %cst_59 : f32 to vector<32x384xf32>
    %143 = arith.maximumf %141, %142 : vector<32x384xf32>
    %cst_60 = arith.constant dense<0.000000e+00> : vector<4x384xf32>
    %144 = tpu.matmul %35, %143, %cst_60 {dimension_numbers = #tpu.dot_dimension_numbers<[1], [0], [0], [1], [0, 0, 1, 1], [], []>} : vector<4x32xf32>, vector<32x384xf32>, vector<4x384xf32> -> vector<4x384xf32>
    %145 = vector.broadcast %36 : vector<4x1xf32> to vector<4x384xf32>
    %146 = arith.addf %144, %145 : vector<4x384xf32>
    %147 = vector.extract_strided_slice %146 {offsets = [0, 0], sizes = [4, 128], strides = [1, 1]} : vector<4x384xf32> to vector<4x128xf32>
    %148 = vector.extract_strided_slice %146 {offsets = [0, 128], sizes = [4, 128], strides = [1, 1]} : vector<4x384xf32> to vector<4x128xf32>
    %149 = vector.extract_strided_slice %146 {offsets = [0, 256], sizes = [4, 128], strides = [1, 1]} : vector<4x384xf32> to vector<4x128xf32>
    %150 = arith.subf %147, %148 : vector<4x128xf32>
    %151 = vector.broadcast %16 : f32 to vector<4x128xf32>
    %152 = arith.mulf %151, %150 : vector<4x128xf32>
    %153 = arith.addf %149, %152 : vector<4x128xf32>
    %154 = arith.subf %148, %149 : vector<4x128xf32>
    %155 = vector.broadcast %17 : f32 to vector<4x128xf32>
    %156 = arith.mulf %155, %154 : vector<4x128xf32>
    %157 = arith.addf %153, %156 : vector<4x128xf32>
    %c12 = arith.constant 12 : index
    %158 = memref.load %arg0[%c12] : memref<20xf32, #tpu.memory_space<smem>>
    %c13 = arith.constant 13 : index
    %159 = memref.load %arg0[%c13] : memref<20xf32, #tpu.memory_space<smem>>
    %c14 = arith.constant 14 : index
    %160 = memref.load %arg0[%c14] : memref<20xf32, #tpu.memory_space<smem>>
    %c15 = arith.constant 15 : index
    %161 = memref.load %arg0[%c15] : memref<20xf32, #tpu.memory_space<smem>>
    %162 = vector.broadcast %159 : f32 to vector<4x128xf32>
    %163 = arith.mulf %162, %157 : vector<4x128xf32>
    %164 = arith.subf %126, %163 : vector<4x128xf32>
    %165 = vector.broadcast %158 : f32 to vector<4x128xf32>
    %166 = arith.mulf %164, %165 : vector<4x128xf32>
    %167 = vector.broadcast %160 : f32 to vector<4x128xf32>
    %168 = arith.mulf %167, %166 : vector<4x128xf32>
    %169 = vector.broadcast %161 : f32 to vector<4x128xf32>
    %170 = arith.mulf %169, %157 : vector<4x128xf32>
    %171 = arith.addf %168, %170 : vector<4x128xf32>
    %c3_61 = arith.constant 3 : index
    %c0_62 = arith.constant 0 : index
    %c0_63 = arith.constant 0 : index
    %172 = vector.load %arg7[%c3_61, %c0_62, %c0_63] : memref<4x96x128xf32, #tpu.memory_space<vmem>>, vector<1x96x128xf32>
    %173 = vector.shape_cast %172 : vector<1x96x128xf32> to vector<96x128xf32>
    %cst_64 = arith.constant dense<0.000000e+00> : vector<32x128xf32>
    %174 = tpu.matmul %34, %171, %cst_64 {dimension_numbers = #tpu.dot_dimension_numbers<[1], [0], [0], [1], [0, 0, 1, 1], [], []>} : vector<32x4xf32>, vector<4x128xf32>, vector<32x128xf32> -> vector<32x128xf32>
    %175 = arith.addf %174, %33 : vector<32x128xf32>
    %176 = vector.extract_strided_slice %173 {offsets = [0, 0], sizes = [32, 128], strides = [1, 1]} : vector<96x128xf32> to vector<32x128xf32>
    %177 = arith.addf %175, %176 : vector<32x128xf32>
    %c0_65 = arith.constant 0 : index
    %c0_66 = arith.constant 0 : index
    %178 = vector.load %arg14[%c0_65, %c0_66] : memref<32x384xf32, #tpu.memory_space<vmem>>, vector<32x128xf32>
    tpu.vector_store %arg14[%c0_65, %c0_66], %177 {strides = array<i32>} : memref<32x384xf32, #tpu.memory_space<vmem>>, vector<32x128xf32>,
    %179 = arith.addf %174, %33 : vector<32x128xf32>
    %180 = vector.extract_strided_slice %173 {offsets = [32, 0], sizes = [32, 128], strides = [1, 1]} : vector<96x128xf32> to vector<32x128xf32>
    %181 = arith.addf %179, %180 : vector<32x128xf32>
    %c0_67 = arith.constant 0 : index
    %c128_68 = arith.constant 128 : index
    %182 = vector.load %arg14[%c0_67, %c128_68] : memref<32x384xf32, #tpu.memory_space<vmem>>, vector<32x128xf32>
    tpu.vector_store %arg14[%c0_67, %c128_68], %181 {strides = array<i32>} : memref<32x384xf32, #tpu.memory_space<vmem>>, vector<32x128xf32>,
    %183 = vector.extract_strided_slice %173 {offsets = [64, 0], sizes = [32, 128], strides = [1, 1]} : vector<96x128xf32> to vector<32x128xf32>
    %184 = arith.addf %174, %183 : vector<32x128xf32>
    %c0_69 = arith.constant 0 : index
    %c256_70 = arith.constant 256 : index
    %185 = vector.load %arg14[%c0_69, %c256_70] : memref<32x384xf32, #tpu.memory_space<vmem>>, vector<32x128xf32>
    tpu.vector_store %arg14[%c0_69, %c256_70], %184 {strides = array<i32>} : memref<32x384xf32, #tpu.memory_space<vmem>>, vector<32x128xf32>,
    %c0_71 = arith.constant 0 : index
    %c0_72 = arith.constant 0 : index
    %186 = vector.load %arg14[%c0_71, %c0_72] : memref<32x384xf32, #tpu.memory_space<vmem>>, vector<32x384xf32>
    %cst_73 = arith.constant 0.000000e+00 : f32
    %187 = vector.broadcast %cst_73 : f32 to vector<32x384xf32>
    %188 = arith.maximumf %186, %187 : vector<32x384xf32>
    %cst_74 = arith.constant dense<0.000000e+00> : vector<4x384xf32>
    %189 = tpu.matmul %35, %188, %cst_74 {dimension_numbers = #tpu.dot_dimension_numbers<[1], [0], [0], [1], [0, 0, 1, 1], [], []>} : vector<4x32xf32>, vector<32x384xf32>, vector<4x384xf32> -> vector<4x384xf32>
    %190 = vector.broadcast %36 : vector<4x1xf32> to vector<4x384xf32>
    %191 = arith.addf %189, %190 : vector<4x384xf32>
    %192 = vector.extract_strided_slice %191 {offsets = [0, 0], sizes = [4, 128], strides = [1, 1]} : vector<4x384xf32> to vector<4x128xf32>
    %193 = vector.extract_strided_slice %191 {offsets = [0, 128], sizes = [4, 128], strides = [1, 1]} : vector<4x384xf32> to vector<4x128xf32>
    %194 = vector.extract_strided_slice %191 {offsets = [0, 256], sizes = [4, 128], strides = [1, 1]} : vector<4x384xf32> to vector<4x128xf32>
    %195 = arith.subf %192, %193 : vector<4x128xf32>
    %196 = vector.broadcast %16 : f32 to vector<4x128xf32>
    %197 = arith.mulf %196, %195 : vector<4x128xf32>
    %198 = arith.addf %194, %197 : vector<4x128xf32>
    %199 = arith.subf %193, %194 : vector<4x128xf32>
    %200 = vector.broadcast %17 : f32 to vector<4x128xf32>
    %201 = arith.mulf %200, %199 : vector<4x128xf32>
    %202 = arith.addf %198, %201 : vector<4x128xf32>
    %c16 = arith.constant 16 : index
    %203 = memref.load %arg0[%c16] : memref<20xf32, #tpu.memory_space<smem>>
    %c17 = arith.constant 17 : index
    %204 = memref.load %arg0[%c17] : memref<20xf32, #tpu.memory_space<smem>>
    %c18 = arith.constant 18 : index
    %205 = memref.load %arg0[%c18] : memref<20xf32, #tpu.memory_space<smem>>
    %c19 = arith.constant 19 : index
    %206 = memref.load %arg0[%c19] : memref<20xf32, #tpu.memory_space<smem>>
    %207 = vector.broadcast %204 : f32 to vector<4x128xf32>
    %208 = arith.mulf %207, %202 : vector<4x128xf32>
    %209 = arith.subf %171, %208 : vector<4x128xf32>
    %210 = vector.broadcast %203 : f32 to vector<4x128xf32>
    %211 = arith.mulf %209, %210 : vector<4x128xf32>
    %212 = vector.broadcast %205 : f32 to vector<4x128xf32>
    %213 = arith.mulf %212, %211 : vector<4x128xf32>
    %214 = vector.broadcast %206 : f32 to vector<4x128xf32>
    %215 = arith.mulf %214, %202 : vector<4x128xf32>
    %216 = arith.addf %213, %215 : vector<4x128xf32>
    %c0_75 = arith.constant 0 : index
    %c0_76 = arith.constant 0 : index
    %217 = vector.load %arg10[%c0_75, %c0_76] : memref<192x4xf32, #tpu.memory_space<vmem>>, vector<192x4xf32>
    %cst_77 = arith.constant 5.4899807 : f32
    %218 = vector.broadcast %cst_77 : f32 to vector<4x128xf32>
    %219 = arith.mulf %216, %218 : vector<4x128xf32>
    %cst_78 = arith.constant dense<0.000000e+00> : vector<192x128xf32>
    %220 = tpu.matmul %217, %219, %cst_78 {dimension_numbers = #tpu.dot_dimension_numbers<[1], [0], [0], [1], [0, 0, 1, 1], [], []>} : vector<192x4xf32>, vector<4x128xf32>, vector<192x128xf32> -> vector<192x128xf32>
    %c0_79 = arith.constant 0 : index
    %c0_80 = arith.constant 0 : index
    %221 = vector.load %arg11[%c0_79, %c0_80] : memref<192x1xf32, #tpu.memory_space<vmem>>, vector<192x1xf32>
    %222 = vector.broadcast %221 : vector<192x1xf32> to vector<192x128xf32>
    %223 = arith.addf %220, %222 : vector<192x128xf32>
    %cst_81 = arith.constant 5.000000e-01 : f32
    %224 = vector.broadcast %cst_81 : f32 to vector<192x128xf32>
    %225 = arith.mulf %223, %224 : vector<192x128xf32>
    %cst_82 = arith.constant 5.000000e-01 : f32
    %226 = vector.broadcast %cst_82 : f32 to vector<192x128xf32>
    %227 = arith.addf %225, %226 : vector<192x128xf32>
    %cst_83 = arith.constant 0.000000e+00 : f32
    %cst_84 = arith.constant 1.000000e+00 : f32
    %228 = vector.broadcast %cst_83 : f32 to vector<192x128xf32>
    %229 = arith.maximumf %228, %227 : vector<192x128xf32>
    %230 = vector.broadcast %cst_84 : f32 to vector<192x128xf32>
    %231 = arith.minimumf %230, %229 : vector<192x128xf32>
    %c0_85 = arith.constant 0 : index
    %c0_86 = arith.constant 0 : index
    %232 = vector.load %arg12[%c0_85, %c0_86] : memref<192x128xf32, #tpu.memory_space<vmem>>, vector<192x128xf32>
    %233 = arith.mulf %231, %232 : vector<192x128xf32>
    %234 = vector.extract_strided_slice %0 {offsets = [0, 128], sizes = [192, 128], strides = [1, 1]} : vector<192x256xf32> to vector<192x128xf32>
    %cst_87 = arith.constant 1.000000e+00 : f32
    %235 = vector.broadcast %cst_87 : f32 to vector<192x128xf32>
    %236 = arith.subf %235, %232 : vector<192x128xf32>
    %237 = arith.mulf %234, %236 : vector<192x128xf32>
    %238 = arith.addf %233, %237 : vector<192x128xf32>
    %c0_88 = arith.constant 0 : index
    %c0_89 = arith.constant 0 : index
    %239 = vector.load %arg13[%c0_88, %c0_89] : memref<192x128xf32, #tpu.memory_space<vmem>>, vector<192x128xf32>
    tpu.vector_store %arg13[%c0_88, %c0_89], %238 {strides = array<i32>} : memref<192x128xf32, #tpu.memory_space<vmem>>, vector<192x128xf32>,
    return
  }
}

</mosaic_0001>

<bundles_post_ra>
// kernel: _edit_image_core.1
= control target key start
LH: loop header
LB: loop body
LE: loop exit
PB: predicated region body
PF: predicated region fallthrough
CT: control target
= control target key end

     0   :  { %18 = vsyncpa [#allocation4], 0  ;;  %s1897_s28 = smov [#allocation3]   ;;  %s2984_s0 = inlined_call_operand.vmem [shape: f32[20], index: 0, kind: input, shape index: {}]   ;;  %s2985_s1 = inlined_call_operand.vmem [shape: f32[192,256], index: 1, kind: input, shape index: {}]   ;;  %s2986_s2 = inlined_call_operand.vmem [shape: f32[8,192], index: 2, kind: input, shape index: {}]   ;;  %s2987_s3 = inlined_call_operand.vmem [shape: f32[8,1], index: 3, kind: input, shape index: {}]   ;;  %s2988_s4 = inlined_call_operand.vmem [shape: f32[8,128], index: 4, kind: input, shape index: {}]   ;;  %s2989_s5 = inlined_call_operand.vmem [shape: f32[32,4], index: 5, kind: input, shape index: {}]   ;;  %s2990_s6 = inlined_call_operand.vmem [shape: f32[32,4], index: 6, kind: input, shape index: {}]   ;;  %s2991_s7 = inlined_call_operand.vmem [shape: f32[4,96,128], index: 7, kind: input, shape index: {}]   ;;  %s2992_s8 = inlined_call_operand.vmem [shape: f32[4,32], index: 8, kind: input, shape index: {}]   ;;  %s2993_s9 = inlined_call_operand.vmem [shape: f32[4,1], index: 9, kind: input, shape index: {}]   ;;  %s2994_s10 = inlined_call_operand.vmem [shape: f32[192,4], index: 10, kind: input, shape index: {}]   ;;  %s2995_s11 = inlined_call_operand.vmem [shape: f32[192,1], index: 11, kind: input, shape index: {}]   ;;  %s2996_s12 = inlined_call_operand.vmem [shape: f32[192,128], index: 12, kind: input, shape index: {}]   ;;  %s2997_s13 = inlined_call_operand.vmem [shape: f32[192,128], index: 13, kind: output, shape index: {}]  }
   0x1   :  { %s24_s27 = sshll.u32 %s2984_s0, 4  ;;  %s25_s27 = int_to_ptr.vmem [resolvable:$true] %s24_s27 }
   0x2   :  { %27 = dma.vmem_to_smem %s25_s27, 16, %s1897_s28, [#allocation4]  }
   0x3   :  { %1895 = dma.done.wait [#allocation4], 16  }
   0x4   :  { %1896 = vsyncadd [#allocation4], 4294967280 }
   0x5   :  { %56 = sfence }
   0x6   :  { %v203_v0 = vld [vmem:[%s2987_s3] sm:$0xff]  ;;  %v87_v1 = vld [vmem:[%s2985_s1 + $0xf0] sm:$0xff]  ;;  %v88_v2 = vld [vmem:[%s2985_s1 + $0xf8] sm:$0xff]  ;;  %v1898_v3 = vmov 0   ;;  %vm209_vm0 = vcmask 523264   ;;  %s1732_s27 = sld [smem:[#allocation3 + $0x1]] }
   0x7   :  { %1854 = vset.pattern.permute.xlu0 %v1898_v3  ;;  %v135_v4 = vmul.f32 2.0, %v87_v1  ;;  %v136_v5 = vmul.f32 2.0, %v88_v2  ;;  %v85_v6 = vld [vmem:[%s2985_s1 + $0xe0] sm:$0xff]  ;;  %v86_v7 = vld [vmem:[%s2985_s1 + $0xe8] sm:$0xff]  ;;  %1855 = vset.pattern.permute.xlu1 %v1898_v3  ;;  %v83_v10 = vld [vmem:[%s2985_s1 + $0xd0] sm:$0xff]  ;;  %vm335_vm1 = vcmask 1043456  }
   0x8   :  { %206 = vperm.xlu0 %1854, %v203_v0   ;;  %v133_v8 = vmul.f32 2.0, %v85_v6  ;;  %v134_v9 = vmul.f32 2.0, %v86_v7  ;;  %v84_v11 = vld [vmem:[%s2985_s1 + $0xd8] sm:$0xff]  ;;  %1856 = vset.pattern.permute.xlu2 %v1898_v3  ;;  %v131_v14 = vmul.f32 2.0, %v83_v10  ;;  %v81_v15 = vld [vmem:[%s2985_s1 + $0xc0] sm:$0xff]  ;;  %v82_v19 = vld [vmem:[%s2985_s1 + $0xc8] sm:$0xff] }
   0x9   :  { %v1712_v12 = vadd.f32 -1.0, %v135_v4  ;;  %v1713_v13 = vadd.f32 -1.0, %v136_v5  ;;  %v132_v18 = vmul.f32 2.0, %v84_v11  ;;  %v129_v21 = vmul.f32 2.0, %v81_v15  ;;  %v79_v22 = vld [vmem:[%s2985_s1 + $0xb0] sm:$0xff]  ;;  %v80_v23 = vld [vmem:[%s2985_s1 + $0xb8] sm:$0xff] }
   0xa   :  { %v1710_v16 = vadd.f32 -1.0, %v133_v8  ;;  %v1711_v17 = vadd.f32 -1.0, %v134_v9  ;;  %v1708_v20 = vadd.f32 -1.0, %v131_v14  ;;  %v130_v25 = vmul.f32 2.0, %v82_v19  ;;  %v77_v27 = vld [vmem:[%s2985_s1 + $0xa0] sm:$0xff]  ;;  %v78_v31 = vld [vmem:[%s2985_s1 + $0xa8] sm:$0xff] }
   0xb   :  { %213 = vmatpush.msra.mxu0 %v1712_v12  ;;  %253 = vmatpush.msra.mxu2 %v1713_v13  ;;  %v1709_v24 = vadd.f32 -1.0, %v132_v18  ;;  %v127_v26 = vmul.f32 2.0, %v79_v22  ;;  %v373_v28 = vld [vmem:[%s2993_s9] sm:$0xf]  ;;  %v1706_v29 = vadd.f32 -1.0, %v129_v21  ;;  %v128_v30 = vmul.f32 2.0, %v80_v23 }
   0xc   :  { %v75_v32 = vld [vmem:[%s2985_s1 + $0x90] sm:$0xff]  ;;  %v1707_v33 = vadd.f32 -1.0, %v130_v25  ;;  %v125_v34 = vmul.f32 2.0, %v77_v27  ;;  %v76_v35 = vld [vmem:[%s2985_s1 + $0x98] sm:$0xff]  ;;  %v126_v38 = vmul.f32 2.0, %v78_v31  ;;  %v73_v39 = vld [vmem:[%s2985_s1 + $0x80] sm:$0xff] }
   0xd   :  { %214 = vmatpush.msra.mxu0 %v1710_v16  ;;  %254 = vmatpush.msra.mxu2 %v1711_v17  ;;  %v1704_v36 = vadd.f32 -1.0, %v127_v26  ;;  %v1705_v37 = vadd.f32 -1.0, %v128_v30  ;;  %v74_v40 = vld [vmem:[%s2985_s1 + $0x88] sm:$0xff]  ;;  %v123_v41 = vmul.f32 2.0, %v75_v32  ;;  %v124_v42 = vmul.f32 2.0, %v76_v35  ;;  %v71_v43 = vld [vmem:[%s2985_s1 + $0x70] sm:$0xff] }
   0xe   :  { %v72_v44 = vld [vmem:[%s2985_s1 + $0x78] sm:$0xff]  ;;  %v1702_v45 = vadd.f32 -1.0, %v125_v34  ;;  %v1703_v46 = vadd.f32 -1.0, %v126_v38  ;;  %v121_v47 = vmul.f32 2.0, %v73_v39  ;;  %v122_v48 = vmul.f32 2.0, %v74_v40  ;;  %v103_v49 = vld [vmem:[%s2985_s1 + $0x170] sm:$0xff] }
   0xf   :  { %215 = vmatpush.msra.mxu0 %v1708_v20  ;;  %255 = vmatpush.msra.mxu2 %v1709_v24  ;;  %v69_v50 = vld [vmem:[%s2985_s1 + $0x60] sm:$0xff]  ;;  %v70_v51 = vld [vmem:[%s2985_s1 + $0x68] sm:$0xff]  ;;  %v1700_v52 = vadd.f32 -1.0, %v123_v41  ;;  %v1701_v53 = vadd.f32 -1.0, %v124_v42  ;;  %v119_v54 = vmul.f32 2.0, %v71_v43  ;;  %v120_v55 = vmul.f32 2.0, %v72_v44 }
  0x10   :  { %484 = vperm.xlu0 %1854, %v373_v28   ;;  %v104_v56 = vld [vmem:[%s2985_s1 + $0x178] sm:$0xff]  ;;  %v1133_v57 = vld [vmem:[%s2995_s11 + $0x20] sm:$0xff]  ;;  %v151_v58 = vmul.f32 2.0, %v103_v49  ;;  %v67_v59 = vld [vmem:[%s2985_s1 + $0x50] sm:$0xff]  ;;  %v1698_v60 = vadd.f32 -1.0, %v121_v47  ;;  %v1699_v61 = vadd.f32 -1.0, %v122_v48 }
  0x11   :  { %216 = vmatpush.msra.mxu0 %v1706_v29  ;;  %256 = vmatpush.msra.mxu2 %v1707_v33  ;;  %v117_v62 = vmul.f32 2.0, %v69_v50  ;;  %v118_v63 = vmul.f32 2.0, %v70_v51  ;;  %v101_v0 = vld [vmem:[%s2985_s1 + $0x160] sm:$0xff]  ;;  %v68_v1 = vld [vmem:[%s2985_s1 + $0x58] sm:$0xff]  ;;  %v152_v3 = vmul.f32 2.0, %v104_v56  ;;  %v102_v4 = vld [vmem:[%s2985_s1 + $0x168] sm:$0xff] }
  0x12   :  { %v1728_v2 = vadd.f32 -1.0, %v151_v58  ;;  %v1696_v5 = vadd.f32 -1.0, %v119_v54  ;;  %v1697_v6 = vadd.f32 -1.0, %v120_v55  ;;  %v115_v7 = vmul.f32 2.0, %v67_v59  ;;  %v65_v8 = vld [vmem:[%s2985_s1 + $0x40] sm:$0xff]  ;;  %v99_v12 = vld [vmem:[%s2985_s1 + $0x150] sm:$0xff] }
  0x13   :  { %217 = vmatpush.msra.mxu0 %v1704_v36  ;;  %257 = vmatpush.msra.mxu2 %v1705_v37  ;;  %v1729_v9 = vadd.f32 -1.0, %v152_v3  ;;  %v149_v10 = vmul.f32 2.0, %v101_v0  ;;  %v116_v11 = vmul.f32 2.0, %v68_v1  ;;  %v66_v13 = vld [vmem:[%s2985_s1 + $0x48] sm:$0xff]  ;;  %v1694_v14 = vadd.f32 -1.0, %v117_v62  ;;  %v100_v17 = vld [vmem:[%s2985_s1 + $0x158] sm:$0xff] }
  0x14   :  { %241 = vmatpush.msra.mxu1 %v1728_v2  ;;  %v1695_v15 = vadd.f32 -1.0, %v118_v63  ;;  %v150_v16 = vmul.f32 2.0, %v102_v4  ;;  %v1692_v18 = vadd.f32 -1.0, %v115_v7  ;;  %v113_v20 = vmul.f32 2.0, %v65_v8  ;;  %v63_v21 = vld [vmem:[%s2985_s1 + $0x30] sm:$0xff]  ;;  %v97_v22 = vld [vmem:[%s2985_s1 + $0x140] sm:$0xff] }
  0x15   :  { %218 = vmatpush.msra.mxu0 %v1702_v45  ;;  %258 = vmatpush.msra.mxu2 %v1703_v46  ;;  %v1726_v19 = vadd.f32 -1.0, %v149_v10  ;;  %v1693_v23 = vadd.f32 -1.0, %v116_v11  ;;  %v147_v25 = vmul.f32 2.0, %v99_v12  ;;  %v114_v26 = vmul.f32 2.0, %v66_v13  ;;  %v64_v27 = vld [vmem:[%s2985_s1 + $0x38] sm:$0xff]  ;;  %v98_v31 = vld [vmem:[%s2985_s1 + $0x148] sm:$0xff] }
  0x16   :  { %281 = vmatpush.msra.mxu3 %v1729_v9  ;;  %v1727_v24 = vadd.f32 -1.0, %v150_v16  ;;  %v1136_v28 = vld [vmem:[%s2995_s11 + $0x38] sm:$0xff]  ;;  %v1690_v29 = vadd.f32 -1.0, %v113_v20  ;;  %v148_v30 = vmul.f32 2.0, %v100_v17  ;;  %v111_v34 = vmul.f32 2.0, %v63_v21  ;;  %v61_v36 = vld [vmem:[%s2985_s1 + $0x20] sm:$0xff] }
  0x17   :  { %219 = vmatpush.msra.mxu0 %v1700_v52  ;;  %259 = vmatpush.msra.mxu2 %v1701_v53  ;;  %v1724_v32 = vadd.f32 -1.0, %v147_v25  ;;  %v1691_v33 = vadd.f32 -1.0, %v114_v26  ;;  %v145_v35 = vmul.f32 2.0, %v97_v22  ;;  %v95_v37 = vld [vmem:[%s2985_s1 + $0x130] sm:$0xff]  ;;  %v112_v39 = vmul.f32 2.0, %v64_v27  ;;  %v62_v40 = vld [vmem:[%s2985_s1 + $0x28] sm:$0xff] }
  0x18   :  { %1175 = vperm.xlu0 %1854, %v1133_v57   ;;  %242 = vmatpush.msra.mxu1 %v1726_v19  ;;  %v1725_v38 = vadd.f32 -1.0, %v148_v30  ;;  %v1688_v41 = vadd.f32 -1.0, %v111_v34  ;;  %v146_v43 = vmul.f32 2.0, %v98_v31  ;;  %v96_v44 = vld [vmem:[%s2985_s1 + $0x138] sm:$0xff]  ;;  %v109_v46 = vmul.f32 2.0, %v61_v36  ;;  %v59_v48 = vld [vmem:[%s2985_s1 + $0x10] sm:$0xff] }
  0x19   :  { %220 = vmatpush.msra.mxu0 %v1698_v60  ;;  %260 = vmatpush.msra.mxu2 %v1699_v61  ;;  %v1722_v42 = vadd.f32 -1.0, %v145_v35  ;;  %v1689_v45 = vadd.f32 -1.0, %v112_v39  ;;  %v143_v47 = vmul.f32 2.0, %v95_v37  ;;  %v110_v50 = vmul.f32 2.0, %v62_v40  ;;  %v93_v51 = vld [vmem:[%s2985_s1 + $0x120] sm:$0xff]  ;;  %v60_v52 = vld [vmem:[%s2985_s1 + $0x18] sm:$0xff] }
  0x1a   :  { %282 = vmatpush.msra.mxu3 %v1727_v24  ;;  %243 = vmatpush.msra.mxu1 %v1724_v32  ;;  %v1723_v49 = vadd.f32 -1.0, %v146_v43  ;;  %v1686_v53 = vadd.f32 -1.0, %v109_v46  ;;  %v144_v55 = vmul.f32 2.0, %v96_v44  ;;  %v94_v56 = vld [vmem:[%s2985_s1 + $0x128] sm:$0xff]  ;;  %v107_v58 = vmul.f32 2.0, %v59_v48  ;;  %v57_v59 = vld [vmem:[%s2985_s1] sm:$0xff] }
  0x1b   :  { %221 = vmatpush.msra.mxu0 %v1696_v5  ;;  %261 = vmatpush.msra.mxu2 %v1697_v6  ;;  %v1720_v54 = vadd.f32 -1.0, %v143_v47  ;;  %v1687_v57 = vadd.f32 -1.0, %v110_v50  ;;  %v141_v61 = vmul.f32 2.0, %v93_v51  ;;  %v108_v62 = vmul.f32 2.0, %v60_v52  ;;  %v91_v63 = vld [vmem:[%s2985_s1 + $0x110] sm:$0xff]  ;;  %v58_v0 = vld [vmem:[%s2985_s1 + $0x8] sm:$0xff] }
  0x1c   :  { %283 = vmatpush.msra.mxu3 %v1725_v38  ;;  %244 = vmatpush.msra.mxu1 %v1722_v42  ;;  %v1721_v60 = vadd.f32 -1.0, %v144_v55  ;;  %v1684_v1 = vadd.f32 -1.0, %v107_v58  ;;  %v142_v2 = vmul.f32 2.0, %v94_v56  ;;  %v92_v3 = vld [vmem:[%s2985_s1 + $0x118] sm:$0xff]  ;;  %v1139_v6 = vld [vmem:[%s2995_s11 + $0x50] sm:$0xff]  ;;  %v105_v7 = vmul.f32 2.0, %v57_v59 }
  0x1d   :  { %222 = vmatpush.msra.mxu0 %v1694_v14  ;;  %262 = vmatpush.msra.mxu2 %v1695_v15  ;;  %v1718_v4 = vadd.f32 -1.0, %v141_v61  ;;  %v1685_v5 = vadd.f32 -1.0, %v108_v62  ;;  %v89_v8 = vld [vmem:[%s2985_s1 + $0x100] sm:$0xff]  ;;  %v90_v9 = vld [vmem:[%s2985_s1 + $0x108] sm:$0xff]  ;;  %v139_v11 = vmul.f32 2.0, %v91_v63  ;;  %v106_v12 = vmul.f32 2.0, %v58_v0 }
  0x1e   :  { %284 = vmatpush.msra.mxu3 %v1723_v49  ;;  %245 = vmatpush.msra.mxu1 %v1720_v54  ;;  %v1719_v10 = vadd.f32 -1.0, %v142_v2  ;;  %v1682_v13 = vadd.f32 -1.0, %v105_v7  ;;  %v140_v14 = vmul.f32 2.0, %v92_v3  ;;  %v201_v17 = vld [vmem:[%s2986_s2] sm:$0xff]  ;;  %v138_v19 = vmul.f32 2.0, %v90_v9  ;;  %v1142_v24 = vld [vmem:[%s2995_s11 + $0x68] sm:$0xff] }
  0x1f   :  { %223 = vmatpush.msra.mxu0 %v1692_v18  ;;  %263 = vmatpush.msra.mxu2 %v1693_v23  ;;  %v1716_v15 = vadd.f32 -1.0, %v139_v11  ;;  %v1683_v16 = vadd.f32 -1.0, %v106_v12  ;;  %v137_v18 = vmul.f32 2.0, %v89_v8  ;;  %v202_v23 = vld [vmem:[%s2986_s2 + $0x8] sm:$0xff]  ;;  %v1145_v25 = vld [vmem:[%s2995_s11 + $0x80] sm:$0xff]  ;;  %v1148_v26 = vld [vmem:[%s2995_s11 + $0x98] sm:$0xff]  ;;  %v312_v43 = vstv %s1732_s27 }
  0x20   :  { %1190 = vperm.xlu0 %1854, %v1136_v28   ;;  %285 = vmatpush.msra.mxu3 %v1721_v60  ;;  %v1717_v20 = vadd.f32 -1.0, %v140_v14  ;;  %v1715_v22 = vadd.f32 -1.0, %v138_v19  ;;  %v1151_v27 = vld [vmem:[%s2995_s11 + $0xb0] sm:$0xff]  ;;  %v293_v37 = vld [vmem:[%s2988_s4] sm:$0xff]  ;;  %vm322_vm2 = vcmask 31744   ;;  %s294_s15 = sld [smem:[#allocation3]] }
  0x21   :  { %224 = vmatpush.msra.mxu0 %v1690_v29  ;;  %264 = vmatpush.msra.mxu2 %v1691_v33  ;;  %v1714_v21 = vadd.f32 -1.0, %v137_v18  ;;  %v318_v40 = vld [vmem:[%s2990_s6] sm:$0xff]  ;;  %v313_v46 = vmul.f32 %v312_v43, %v293_v37  ;;  %v319_v47 = vld [vmem:[%s2990_s6 + $0x8] sm:$0xff]  ;;  %v320_v55 = vld [vmem:[%s2990_s6 + $0x10] sm:$0xff]  ;;  %vm487_vm3 = vcmask 261120   ;;  %s1749_s26 = sld [smem:[#allocation3 + $0x5]] }
  0x22   :  { %246 = vmatpush.msra.mxu1 %v1718_v4  ;;  %286 = vmatpush.msra.mxu3 %v1719_v10  ;;  %v2166_v54 = vld [vmem:[%s2989_s5] sm:$0xff]  ;;  %v2179_v56 = vld [vmem:[%s2989_s5 + $0x8] sm:$0xff]  ;;  %v2190_v58 = vld [vmem:[%s2989_s5 + $0x10] sm:$0xff]  ;;  %s1748_s27 = sld [smem:[#allocation3 + $0x4]] }
  0x23   :  { %225 = vmatpush.msra.mxu0 %v1688_v41  ;;  %265 = vmatpush.msra.mxu2 %v1689_v45  ;;  %v302_v41 = vrot.slane %v293_v37, 4  ;;  %v315_v51 = vrot.slane %v313_v46, 4  ;;  %v2197_v59 = vld [vmem:[%s2989_s5 + $0x18] sm:$0xff]  ;;  %v376_v4 = vld [vmem:[%s2991_s7 + $0x10] sm:$0xff]  ;;  %v375_v12 = vld [vmem:[%s2991_s7 + $0x8] sm:$0xff]  ;;  %s1734_s5 = sld [smem:[#allocation3 + $0x3]] }
  0x24   :  { %247 = vmatpush.msra.mxu1 %v1716_v15  ;;  %287 = vmatpush.msra.mxu3 %v1717_v20  ;;  %v381_v7 = vld [vmem:[%s2991_s7 + $0x38] sm:$0xff]  ;;  %v380_v8 = vld [vmem:[%s2991_s7 + $0x30] sm:$0xff]  ;;  %v374_v18 = vld [vmem:[%s2991_s7] sm:$0xff]  ;;  %s1751_s28 = sld [smem:[#allocation3 + $0x7]] }
  0x25   :  { %226 = vmatpush.msra.mxu0 %v1686_v53  ;;  %266 = vmatpush.msra.mxu2 %v1687_v57  ;;  %v321_v57 = vld [vmem:[%s2990_s6 + $0x18] sm:$0xff]  ;;  %v378_v19 = vld [vmem:[%s2991_s7 + $0x20] sm:$0xff]  ;;  %s1750_s29 = sld [smem:[#allocation3 + $0x6]] }
  0x26   :  { %248 = vmatpush.msra.mxu1 %v1714_v21  ;;  %288 = vmatpush.msra.mxu3 %v1715_v22  ;;  %v310_v49 = vstv %s294_s15  ;;  %v2249_v37 = vld [vmem:[%s2992_s8] sm:$0xf]  ;;  %s1733_s8 = sld [smem:[#allocation3 + $0x2]] }
  0x27   :  { %227 = vmatpush.msra.mxu0 %v1684_v1  ;;  %267 = vmatpush.msra.mxu2 %v1685_v5  ;;  %s1772_s30 = sld [smem:[#allocation3 + $0x8]] }
  0x28   :  { %1205 = vperm.xlu0 %1854, %v1139_v6   ;;  %1730 = vmatmul.msk.f32.vlgmr.msra.gmra.mxu1 %vm209_vm0, %v202_v23  ;;  %v377_v6 = vld [vmem:[%s2991_s7 + $0x18] sm:$0xff]  ;;  %s1775_s14 = sld [smem:[#allocation3 + $0xb]] }
  0x29   :  { %228 = vmatpush.msra.mxu0 %v1682_v13  ;;  %268 = vmatpush.msra.mxu2 %v1683_v16  ;;  %v379_v13 = vld [vmem:[%s2991_s7 + $0x28] sm:$0xff]  ;;  %s1774_s15 = sld [smem:[#allocation3 + $0xa]] }
  0x2a   :  { %229 = vmatmul.f32.vlgmr.msra.gmra.mxu0 %v201_v17  ;;  %269 = vmatmul.f32.vlgmr.msra.gmra.mxu2 %v201_v17  ;;  %s1796_s4 = sld [smem:[#allocation3 + $0xc]] }
  0x2b   :  { %1731 = vmatmul.msk.f32.vlgmr.msra.gmra.mxu3 %vm209_vm0, %v202_v23  ;;  %s1799_s16 = sld [smem:[#allocation3 + $0xf]] }
  0x2c   :  { %s1798_s17 = sld [smem:[#allocation3 + $0xe]] }
  0x2d   :  { %s1820_s19 = sld [smem:[#allocation3 + $0x10]] }
  0x2e   :  { %s1822_s20 = sld [smem:[#allocation3 + $0x12]] }
  0x30   :  { %1220 = vperm.xlu0 %1854, %v1142_v24   ;;  %v385_v24 = vld [vmem:[%s2991_s7 + $0x58] sm:$0xff] }
  0x38   :  { %1235 = vperm.xlu0 %1854, %v1145_v25  }
  0x40   :  { %1250 = vperm.xlu0 %1854, %v1148_v26  }
  0x48   :  { %1265 = vperm.xlu0 %1854, %v1151_v27  }
  0x7a   :  { %v207_v28 = vpop.permute.xlu0 %206 }
  0x82   :  { %v2260_v46 = vpop.permute.xlu0 %484 }
  0xa5   :  { %v250_v31 = vpop.f32.mrf.mxu1 }
  0xa7   :  { %v230_v29 = vpop.f32.mrf.mxu0 }
  0xa8   :  { %v231_v30 = vadd.f32 %v230_v29, %v207_v28  ;;  %v384_v29 = vld [vmem:[%s2991_s7 + $0x50] sm:$0xff] }
  0xaa   :  { %v251_v32 = vadd.f32 %v250_v31, %v231_v30 }
  0xac   :  { %v298_v33 = vmul.f32 0.5, %v251_v32 }
  0xad   :  { %v270_v35 = vpop.f32.mrf.mxu2 }
  0xae   :  { %v299_v34 = vmul.f32 1.442695, %v298_v33  ;;  %v271_v36 = vadd.f32 %v270_v35, %v207_v28  ;;  %v290_v38 = vpop.f32.mrf.mxu3  ;;  %v383_v33 = vld [vmem:[%s2991_s7 + $0x48] sm:$0xff] }
  0xb0   :  { %1857 = vpow2.f32 %v299_v34  ;;  %v291_v39 = vadd.f32 %v290_v38, %v271_v36  ;;  %v382_v38 = vld [vmem:[%s2991_s7 + $0x40] sm:$0xff] }
  0xb2   :  { %1735 = vmatpush.msk.msrb.mxu1 %vm335_vm1, %v291_v39 }
  0xb3   :  { %1736 = vmatmul.msk.f32.vlgmr.msrb.gmra.mxu1 %vm322_vm2, %v318_v40 }
  0xb6   :  { %v1858_v42 = vpop.eup %1857 }
  0xb7   :  { %v304_v44 = vmul.f32 %v1858_v42, %v302_v41 }
  0xb9   :  { %v306_v45 = vrot.slane %v304_v44, 4 }
  0xbb   :  { %v308_v48 = vadd.f32 %v306_v45, %v251_v32  ;;  %1737 = vmatmul.msk.f32.gmra.mxu1 %vm322_vm2, %v319_v47 }
  0xbd   :  { %v309_v50 = vmul.f32 0.18215, %v308_v48 }
  0xbf   :  { %v311_v52 = vmul.f32 %v310_v49, %v309_v50 }
  0xc1   :  { %v2161_v53 = vadd.f32 %v315_v51, %v311_v52  ;;  %v2264_v51 = vstv %s1733_s8 }
  0xc3   :  { %1740 = vmatpush.msk.msrb.mxu3 %vm335_vm1, %v2161_v53  ;;  %1738 = vmatmul.msk.f32.gmra.mxu1 %vm322_vm2, %v320_v55 }
  0xc4   :  { %1741 = vmatmul.msk.f32.vlgmr.msrb.gmra.mxu3 %vm322_vm2, %v2166_v54 }
  0xcb   :  { %1739 = vmatmul.msk.f32.gmra.mxu1 %vm322_vm2, %v321_v57  ;;  %v2267_v57 = vstv %s1734_s5 }
  0xcc   :  { %1742 = vmatmul.msk.f32.gmra.mxu3 %vm322_vm2, %v2179_v56 }
  0xd4   :  { %1743 = vmatmul.msk.f32.gmra.mxu3 %vm322_vm2, %v2190_v58 }
  0xdc   :  { %1744 = vmatmul.msk.f32.gmra.mxu3 %vm322_vm2, %v2197_v59 }
 0x130   :  { %v2201_v60 = vpop.f32.mrf.mxu1 }
 0x138   :  { %v2203_v62 = vpop.f32.mrf.mxu1 }
 0x140   :  { %v2205_v0 = vpop.f32.mrf.mxu1 }
 0x147   :  { %v418_v61 = vpop.f32.mrf.mxu3 }
 0x148   :  { %v2207_v2 = vpop.f32.mrf.mxu1  ;;  %v430_v11 = vadd.f32 %v418_v61, %v2201_v60  ;;  %v450_v41 = vadd.f32 %v418_v61, %v382_v38 }
 0x14a   :  { %v434_v27 = vadd.f32 %v430_v11, %v374_v18  ;;  %v442_v28 = vadd.f32 %v430_v11, %v378_v19  ;;  %v472_v44 = vmax.f32 %v450_v41, 0.0  ;;  %v1763_v18 = vld [vmem:[%s2991_s7 + $0xb8] sm:$0xff]  ;;  %v1754_v19 = vld [vmem:[%s2991_s7 + $0x70] sm:$0xff] }
 0x14c   :  { %v470_v35 = vmax.f32 %v434_v27, 0.0  ;;  %v471_v36 = vmax.f32 %v442_v28, 0.0 }
 0x14f   :  { %v421_v63 = vpop.f32.mrf.mxu3 }
 0x150   :  { %v431_v9 = vadd.f32 %v421_v63, %v2203_v62  ;;  %v451_v39 = vadd.f32 %v421_v63, %v383_v33 }
 0x152   :  { %v435_v22 = vadd.f32 %v431_v9, %v375_v12  ;;  %v443_v23 = vadd.f32 %v431_v9, %v379_v13  ;;  %v475_v43 = vmax.f32 %v451_v39, 0.0  ;;  %v568_v9 = vstv %s1750_s29  ;;  %s1773_s29 = sld [smem:[#allocation3 + $0x9]] }
 0x154   :  { %v473_v31 = vmax.f32 %v435_v22, 0.0  ;;  %v474_v32 = vmax.f32 %v443_v23, 0.0  ;;  %v1755_v22 = vld [vmem:[%s2991_s7 + $0x78] sm:$0xff] }
 0x155   :  { %v1759_v23 = vld [vmem:[%s2991_s7 + $0x98] sm:$0xff] }
 0x157   :  { %v424_v1 = vpop.f32.mrf.mxu3 }
 0x158   :  { %v432_v3 = vadd.f32 %v424_v1, %v2205_v0  ;;  %v452_v34 = vadd.f32 %v424_v1, %v384_v29 }
 0x15a   :  { %v436_v16 = vadd.f32 %v432_v3, %v376_v4  ;;  %v444_v17 = vadd.f32 %v432_v3, %v380_v8  ;;  %v478_v42 = vmax.f32 %v452_v34, 0.0  ;;  %v563_v4 = vstv %s1749_s26  ;;  %v1760_v34 = vld [vmem:[%s2991_s7 + $0xa0] sm:$0xff] }
 0x15c   :  { %v476_v25 = vmax.f32 %v436_v16, 0.0  ;;  %v477_v26 = vmax.f32 %v444_v17, 0.0 }
 0x15f   :  { %v427_v5 = vpop.f32.mrf.mxu3 }
 0x160   :  { %v433_v10 = vadd.f32 %v427_v5, %v2207_v2  ;;  %v453_v30 = vadd.f32 %v427_v5, %v385_v24 }
 0x162   :  { %v437_v14 = vadd.f32 %v433_v10, %v377_v6  ;;  %v445_v15 = vadd.f32 %v433_v10, %v381_v7  ;;  %v481_v40 = vmax.f32 %v453_v30, 0.0  ;;  %v566_v7 = vstv %s1748_s27  ;;  %v1753_v30 = vld [vmem:[%s2991_s7 + $0x68] sm:$0xff] }
 0x163   :  { %v570_v10 = vstv %s1751_s28 }
 0x164   :  { %v479_v20 = vmax.f32 %v437_v14, 0.0  ;;  %v480_v21 = vmax.f32 %v445_v15, 0.0 }
 0x166   :  { %503 = vmatpush.msrb.mxu0 %v479_v20  ;;  %523 = vmatpush.msrb.mxu2 %v480_v21  ;;  %v1762_v20 = vld [vmem:[%s2991_s7 + $0xb0] sm:$0xff] }
 0x167   :  { %v1758_v21 = vld [vmem:[%s2991_s7 + $0x90] sm:$0xff] }
 0x168   :  { %504 = vmatpush.msrb.mxu0 %v476_v25  ;;  %524 = vmatpush.msrb.mxu2 %v477_v26  ;;  %v1761_v25 = vld [vmem:[%s2991_s7 + $0xa8] sm:$0xff] }
 0x16a   :  { %505 = vmatpush.msrb.mxu0 %v473_v31  ;;  %525 = vmatpush.msrb.mxu2 %v474_v32  ;;  %v1757_v31 = vld [vmem:[%s2991_s7 + $0x88] sm:$0xff] }
 0x16c   :  { %506 = vmatpush.msrb.mxu0 %v470_v35  ;;  %526 = vmatpush.msrb.mxu2 %v471_v36 }
 0x16d   :  { %1745 = vmatmul.msk.f32.vlgmr.msrb.gmra.mxu0 %vm487_vm3, %v2249_v37  ;;  %1746 = vmatmul.msk.f32.vlgmr.msrb.gmra.mxu2 %vm487_vm3, %v2249_v37 }
 0x16e   :  { %543 = vmatpush.msra.mxu0 %v481_v40  ;;  %v1752_v40 = vld [vmem:[%s2991_s7 + $0x60] sm:$0xff] }
 0x170   :  { %544 = vmatpush.msra.mxu0 %v478_v42  ;;  %v1756_v42 = vld [vmem:[%s2991_s7 + $0x80] sm:$0xff] }
 0x172   :  { %545 = vmatpush.msra.mxu0 %v475_v43 }
 0x174   :  { %546 = vmatpush.msra.mxu0 %v472_v44 }
 0x175   :  { %1747 = vmatmul.msk.f32.vlgmr.msra.gmra.mxu0 %vm487_vm3, %v2249_v37 }
 0x1ea   :  { %v508_v45 = vpop.f32.mrf.mxu0 }
 0x1eb   :  { %v509_v48 = vadd.f32 %v508_v45, %v2260_v46 }
 0x1f0   :  { %v528_v47 = vpop.f32.mrf.mxu2 }
 0x1f1   :  { %v529_v49 = vadd.f32 %v528_v47, %v2260_v46 }
 0x1f2   :  { %v548_v50 = vpop.f32.mrf.mxu0 }
 0x1f3   :  { %v551_v52 = vsub.f32 %v509_v48, %v529_v49  ;;  %v549_v55 = vadd.f32 %v548_v50, %v2260_v46 }
 0x1f5   :  { %v553_v61 = vmul.f32 %v2264_v51, %v551_v52  ;;  %v555_v63 = vsub.f32 %v529_v49, %v549_v55 }
 0x1f7   :  { %v554_v1 = vadd.f32 %v553_v61, %v549_v55  ;;  %v557_v3 = vmul.f32 %v2267_v57, %v555_v63 }
 0x1f9   :  { %v558_v5 = vadd.f32 %v557_v3, %v554_v1 }
 0x1fb   :  { %v564_v6 = vmul.f32 %v563_v4, %v558_v5  ;;  %v571_v13 = vmul.f32 %v570_v10, %v558_v5 }
 0x1fd   :  { %v565_v8 = vsub.f32 %v2161_v53, %v564_v6 }
 0x1ff   :  { %v567_v11 = vmul.f32 %v566_v7, %v565_v8 }
 0x201   :  { %v569_v12 = vmul.f32 %v568_v9, %v567_v11 }
 0x203   :  { %v2272_v14 = vadd.f32 %v571_v13, %v569_v12 }
 0x205   :  { %1764 = vmatpush.msk.msra.mxu2 %vm335_vm1, %v2272_v14 }
 0x206   :  { %1765 = vmatmul.msk.f32.vlgmr.msra.gmra.mxu2 %vm322_vm2, %v2166_v54 }
 0x20e   :  { %1766 = vmatmul.msk.f32.gmra.mxu2 %vm322_vm2, %v2179_v56 }
 0x216   :  { %1767 = vmatmul.msk.f32.gmra.mxu2 %vm322_vm2, %v2190_v58 }
 0x21e   :  { %1768 = vmatmul.msk.f32.gmra.mxu2 %vm322_vm2, %v2197_v59 }
 0x289   :  { %v606_v53 = vpop.f32.mrf.mxu2 }
 0x28a   :  { %v618_v29 = vadd.f32 %v606_v53, %v2201_v60  ;;  %v638_v48 = vadd.f32 %v1760_v34, %v606_v53  ;;  %v1779_v34 = vld [vmem:[%s2991_s7 + $0xd8] sm:$0xff] }
 0x28c   :  { %v622_v50 = vadd.f32 %v1752_v40, %v618_v29  ;;  %v630_v61 = vadd.f32 %v1756_v42, %v618_v29  ;;  %v660_v4 = vmax.f32 %v638_v48, 0.0  ;;  %v1781_v42 = vld [vmem:[%s2991_s7 + $0xe8] sm:$0xff]  ;;  %v1776_v48 = vld [vmem:[%s2991_s7 + $0xc0] sm:$0xff] }
 0x28e   :  { %v658_v5 = vmax.f32 %v622_v50, 0.0  ;;  %v659_v6 = vmax.f32 %v630_v61, 0.0 }
 0x291   :  { %v609_v15 = vpop.f32.mrf.mxu2 }
 0x292   :  { %v619_v26 = vadd.f32 %v609_v15, %v2203_v62  ;;  %v639_v41 = vadd.f32 %v1761_v25, %v609_v15 }
 0x294   :  { %v623_v43 = vadd.f32 %v1753_v30, %v619_v26  ;;  %v631_v44 = vadd.f32 %v1757_v31, %v619_v26  ;;  %v663_v63 = vmax.f32 %v639_v41, 0.0  ;;  %v1778_v31 = vld [vmem:[%s2991_s7 + $0xd0] sm:$0xff]  ;;  %v1777_v41 = vld [vmem:[%s2991_s7 + $0xc8] sm:$0xff] }
 0x296   :  { %v661_v1 = vmax.f32 %v623_v43, 0.0  ;;  %v662_v3 = vmax.f32 %v631_v44, 0.0 }
 0x299   :  { %v612_v16 = vpop.f32.mrf.mxu2 }
 0x29a   :  { %v620_v17 = vadd.f32 %v612_v16, %v2205_v0  ;;  %v640_v33 = vadd.f32 %v1762_v20, %v612_v16 }
 0x29c   :  { %v624_v32 = vadd.f32 %v1754_v19, %v620_v17  ;;  %v632_v35 = vadd.f32 %v1758_v21, %v620_v17  ;;  %v666_v49 = vmax.f32 %v640_v33, 0.0  ;;  %v743_v21 = vstv %s1772_s30  ;;  %v1782_v33 = vld [vmem:[%s2991_s7 + $0xf0] sm:$0xff] }
 0x29e   :  { %v664_v52 = vmax.f32 %v624_v32, 0.0  ;;  %v665_v55 = vmax.f32 %v632_v35, 0.0  ;;  %v1783_v35 = vld [vmem:[%s2991_s7 + $0xf8] sm:$0xff] }
 0x2a1   :  { %v615_v24 = vpop.f32.mrf.mxu2 }
 0x2a2   :  { %v621_v27 = vadd.f32 %v615_v24, %v2207_v2  ;;  %v641_v28 = vadd.f32 %v1763_v18, %v615_v24  ;;  %v740_v18 = vstv %s1773_s29  ;;  %v747_v24 = vstv %s1775_s14 }
 0x2a4   :  { %v625_v36 = vadd.f32 %v1755_v22, %v621_v27  ;;  %v633_v38 = vadd.f32 %v1759_v23, %v621_v27  ;;  %v669_v39 = vmax.f32 %v641_v28, 0.0  ;;  %v745_v23 = vstv %s1774_s15  ;;  %s1797_s15 = sld [smem:[#allocation3 + $0xd]] }
 0x2a6   :  { %v667_v45 = vmax.f32 %v625_v36, 0.0  ;;  %v668_v47 = vmax.f32 %v633_v38, 0.0  ;;  %722 = vmatpush.msra.mxu3 %v669_v39 }
 0x2a8   :  { %682 = vmatpush.msrb.mxu0 %v667_v45  ;;  %702 = vmatpush.msra.mxu1 %v668_v47 }
 0x2a9   :  { %723 = vmatpush.msra.mxu3 %v666_v49  ;;  %v1780_v49 = vld [vmem:[%s2991_s7 + $0xe0] sm:$0xff] }
 0x2aa   :  { %683 = vmatpush.msrb.mxu0 %v664_v52  ;;  %703 = vmatpush.msra.mxu1 %v665_v55 }
 0x2ab   :  { %724 = vmatpush.msra.mxu3 %v663_v63  ;;  %v1787_v63 = vld [vmem:[%s2991_s7 + $0x118] sm:$0xff] }
 0x2ac   :  { %684 = vmatpush.msrb.mxu0 %v661_v1  ;;  %704 = vmatpush.msra.mxu1 %v662_v3 }
 0x2ad   :  { %725 = vmatpush.msra.mxu3 %v660_v4 }
 0x2ae   :  { %1771 = vmatmul.msk.f32.vlgmr.msra.gmra.mxu3 %vm487_vm3, %v2249_v37  ;;  %685 = vmatpush.msrb.mxu0 %v658_v5 }
 0x2af   :  { %705 = vmatpush.msra.mxu1 %v659_v6  ;;  %1769 = vmatmul.msk.f32.vlgmr.msrb.gmra.mxu0 %vm487_vm3, %v2249_v37  ;;  %v1786_v6 = vld [vmem:[%s2991_s7 + $0x110] sm:$0xff] }
 0x2b0   :  { %1770 = vmatmul.msk.f32.vlgmr.msra.gmra.mxu1 %vm487_vm3, %v2249_v37 }
 0x32c   :  { %v687_v7 = vpop.f32.mrf.mxu0 }
 0x32d   :  { %v688_v8 = vadd.f32 %v687_v7, %v2260_v46  ;;  %v707_v9 = vpop.f32.mrf.mxu1 }
 0x32e   :  { %v708_v10 = vadd.f32 %v707_v9, %v2260_v46 }
 0x330   :  { %v730_v11 = vsub.f32 %v688_v8, %v708_v10 }
 0x331   :  { %v727_v12 = vpop.f32.mrf.mxu3 }
 0x332   :  { %v728_v13 = vadd.f32 %v727_v12, %v2260_v46  ;;  %v731_v53 = vmul.f32 %v730_v11, %v2264_v51 }
 0x334   :  { %v733_v15 = vsub.f32 %v708_v10, %v728_v13  ;;  %v732_v16 = vadd.f32 %v731_v53, %v728_v13  ;;  %v1785_v10 = vld [vmem:[%s2991_s7 + $0x108] sm:$0xff]  ;;  %v1784_v53 = vld [vmem:[%s2991_s7 + $0x100] sm:$0xff] }
 0x336   :  { %v734_v17 = vmul.f32 %v733_v15, %v2267_v57 }
 0x338   :  { %v735_v19 = vadd.f32 %v734_v17, %v732_v16 }
 0x33a   :  { %v741_v20 = vmul.f32 %v740_v18, %v735_v19  ;;  %v748_v27 = vmul.f32 %v747_v24, %v735_v19 }
 0x33c   :  { %v742_v22 = vsub.f32 %v2272_v14, %v741_v20 }
 0x33e   :  { %v744_v25 = vmul.f32 %v743_v21, %v742_v22 }
 0x340   :  { %v746_v26 = vmul.f32 %v745_v23, %v744_v25 }
 0x342   :  { %v2336_v28 = vadd.f32 %v748_v27, %v746_v26 }
 0x344   :  { %1788 = vmatpush.msk.msra.mxu0 %vm335_vm1, %v2336_v28 }
 0x345   :  { %1789 = vmatmul.msk.f32.vlgmr.msra.gmra.mxu0 %vm322_vm2, %v2166_v54 }
 0x34d   :  { %1790 = vmatmul.msk.f32.gmra.mxu0 %vm322_vm2, %v2179_v56 }
 0x355   :  { %1791 = vmatmul.msk.f32.gmra.mxu0 %vm322_vm2, %v2190_v58 }
 0x35d   :  { %1792 = vmatmul.msk.f32.gmra.mxu0 %vm322_vm2, %v2197_v59 }
 0x3c2   :  { %v783_v14 = vpop.f32.mrf.mxu0 }
 0x3c3   :  { %v795_v40 = vadd.f32 %v783_v14, %v2201_v60  ;;  %v815_v17 = vadd.f32 %v1784_v53, %v783_v14  ;;  %v1810_v53 = vld [vmem:[%s2991_s7 + $0x170] sm:$0xff] }
 0x3c5   :  { %v799_v1 = vadd.f32 %v1776_v48, %v795_v40  ;;  %v807_v3 = vadd.f32 %v1780_v49, %v795_v40  ;;  %v837_v20 = vmax.f32 %v815_v17, 0.0  ;;  %v1803_v48 = vld [vmem:[%s2991_s7 + $0x138] sm:$0xff] }
 0x3c6   :  { %v1807_v49 = vld [vmem:[%s2991_s7 + $0x158] sm:$0xff] }
 0x3c7   :  { %v835_v12 = vmax.f32 %v799_v1, 0.0  ;;  %v836_v13 = vmax.f32 %v807_v3, 0.0 }
 0x3ca   :  { %v786_v29 = vpop.f32.mrf.mxu0 }
 0x3cb   :  { %v796_v38 = vadd.f32 %v786_v29, %v2203_v62  ;;  %v816_v15 = vadd.f32 %v1785_v10, %v786_v29 }
 0x3cd   :  { %v800_v50 = vadd.f32 %v1777_v41, %v796_v38  ;;  %v808_v52 = vadd.f32 %v1781_v42, %v796_v38  ;;  %v840_v19 = vmax.f32 %v816_v15, 0.0  ;;  %v922_v38 = vstv %s1798_s17  ;;  %s1821_s17 = sld [smem:[#allocation3 + $0x11]] }
 0x3cf   :  { %v838_v8 = vmax.f32 %v800_v50, 0.0  ;;  %v839_v9 = vmax.f32 %v808_v52, 0.0 }
 0x3d2   :  { %v789_v30 = vpop.f32.mrf.mxu0 }
 0x3d3   :  { %v797_v32 = vadd.f32 %v789_v30, %v2205_v0  ;;  %v817_v11 = vadd.f32 %v1786_v6, %v789_v30 }
 0x3d5   :  { %v801_v43 = vadd.f32 %v1778_v31, %v797_v32  ;;  %v809_v44 = vadd.f32 %v1782_v33, %v797_v32  ;;  %v843_v18 = vmax.f32 %v817_v11, 0.0  ;;  %v917_v32 = vstv %s1797_s15 }
 0x3d7   :  { %v841_v4 = vmax.f32 %v801_v43, 0.0  ;;  %v842_v5 = vmax.f32 %v809_v44, 0.0 }
 0x3da   :  { %v792_v36 = vpop.f32.mrf.mxu0 }
 0x3db   :  { %v798_v39 = vadd.f32 %v792_v36, %v2207_v2  ;;  %v818_v7 = vadd.f32 %v1787_v63, %v792_v36  ;;  %v1805_v63 = vld [vmem:[%s2991_s7 + $0x148] sm:$0xff] }
 0x3dd   :  { %v802_v45 = vadd.f32 %v1779_v34, %v798_v39  ;;  %v810_v47 = vadd.f32 %v1783_v35, %v798_v39  ;;  %v846_v16 = vmax.f32 %v818_v7, 0.0  ;;  %v920_v35 = vstv %s1796_s4 }
 0x3de   :  { %v924_v39 = vstv %s1799_s16 }
 0x3df   :  { %v844_v55 = vmax.f32 %v802_v45, 0.0  ;;  %v845_v61 = vmax.f32 %v810_v47, 0.0  ;;  %v1129_v45 = vld [vmem:[%s2995_s11] sm:$0xff] }
 0x3e0   :  { %1155 = vperm.xlu1 %1855, %v1129_v45   ;;  %v1141_v45 = vld [vmem:[%s2995_s11 + $0x60] sm:$0xff] }
 0x3e1   :  { %859 = vmatpush.msrb.mxu1 %v844_v55  ;;  %879 = vmatpush.msrb.mxu3 %v845_v61  ;;  %v1801_v61 = vld [vmem:[%s2991_s7 + $0x128] sm:$0xff] }
 0x3e3   :  { %860 = vmatpush.msrb.mxu1 %v841_v4  ;;  %880 = vmatpush.msrb.mxu3 %v842_v5 }
 0x3e5   :  { %861 = vmatpush.msrb.mxu1 %v838_v8  ;;  %881 = vmatpush.msrb.mxu3 %v839_v9  ;;  %v1811_v9 = vld [vmem:[%s2991_s7 + $0x178] sm:$0xff] }
 0x3e7   :  { %862 = vmatpush.msrb.mxu1 %v835_v12  ;;  %882 = vmatpush.msrb.mxu3 %v836_v13 }
 0x3e8   :  { %1793 = vmatmul.msk.f32.vlgmr.msrb.gmra.mxu1 %vm487_vm3, %v2249_v37  ;;  %1794 = vmatmul.msk.f32.vlgmr.msrb.gmra.mxu3 %vm487_vm3, %v2249_v37 }
 0x3e9   :  { %899 = vmatpush.msra.mxu1 %v846_v16 }
 0x3eb   :  { %900 = vmatpush.msra.mxu1 %v843_v18  ;;  %v1809_v18 = vld [vmem:[%s2991_s7 + $0x168] sm:$0xff] }
 0x3ed   :  { %901 = vmatpush.msra.mxu1 %v840_v19 }
 0x3ef   :  { %902 = vmatpush.msra.mxu1 %v837_v20 }
 0x3f0   :  { %1795 = vmatmul.msk.f32.vlgmr.msra.gmra.mxu1 %vm487_vm3, %v2249_v37 }
 0x465   :  { %v864_v21 = vpop.f32.mrf.mxu1 }
 0x466   :  { %v865_v23 = vadd.f32 %v864_v21, %v2260_v46 }
 0x46b   :  { %v884_v22 = vpop.f32.mrf.mxu3 }
 0x46c   :  { %v885_v24 = vadd.f32 %v884_v22, %v2260_v46  ;;  %v1808_v22 = vld [vmem:[%s2991_s7 + $0x160] sm:$0xff] }
 0x46d   :  { %v904_v25 = vpop.f32.mrf.mxu1 }
 0x46e   :  { %v907_v26 = vsub.f32 %v865_v23, %v885_v24  ;;  %v905_v27 = vadd.f32 %v904_v25, %v2260_v46 }
 0x470   :  { %v908_v14 = vmul.f32 %v907_v26, %v2264_v51  ;;  %v910_v29 = vsub.f32 %v885_v24, %v905_v27 }
 0x472   :  { %v909_v30 = vadd.f32 %v908_v14, %v905_v27  ;;  %v911_v31 = vmul.f32 %v910_v29, %v2267_v57  ;;  %v1134_v29 = vld [vmem:[%s2995_s11 + $0x28] sm:$0xff] }
 0x474   :  { %v912_v33 = vadd.f32 %v911_v31, %v909_v30  ;;  %v1137_v30 = vld [vmem:[%s2995_s11 + $0x40] sm:$0xff]  ;;  %v1140_v31 = vld [vmem:[%s2995_s11 + $0x58] sm:$0xff] }
 0x476   :  { %v918_v34 = vmul.f32 %v917_v32, %v912_v33  ;;  %v925_v42 = vmul.f32 %v924_v39, %v912_v33  ;;  %v1131_v32 = vld [vmem:[%s2995_s11 + $0x10] sm:$0xff]  ;;  %v1132_v33 = vld [vmem:[%s2995_s11 + $0x18] sm:$0xff]  ;;  %v1138_v39 = vld [vmem:[%s2995_s11 + $0x48] sm:$0xff] }
 0x477   :  { %1165 = vperm.xlu2 %1856, %v1131_v32  }
 0x478   :  { %v919_v36 = vsub.f32 %v2336_v28, %v918_v34  ;;  %v1146_v34 = vld [vmem:[%s2995_s11 + $0x88] sm:$0xff] }
 0x47a   :  { %v921_v40 = vmul.f32 %v920_v35, %v919_v36  ;;  %v1135_v35 = vld [vmem:[%s2995_s11 + $0x30] sm:$0xff]  ;;  %v1149_v36 = vld [vmem:[%s2995_s11 + $0xa0] sm:$0xff] }
 0x47c   :  { %v923_v41 = vmul.f32 %v922_v38, %v921_v40  ;;  %v1152_v40 = vld [vmem:[%s2995_s11 + $0xb8] sm:$0xff] }
 0x47e   :  { %v2400_v43 = vadd.f32 %v925_v42, %v923_v41 }
 0x47f   :  { %1170 = vperm.xlu2 %1856, %v1132_v33  }
 0x480   :  { %1812 = vmatpush.msk.msra.mxu3 %vm335_vm1, %v2400_v43 }
 0x481   :  { %1813 = vmatmul.msk.f32.vlgmr.msra.gmra.mxu3 %vm322_vm2, %v2166_v54  ;;  %v1130_v54 = vld [vmem:[%s2995_s11 + $0x8] sm:$0xff] }
 0x482   :  { %1160 = vperm.xlu1 %1855, %v1130_v54  }
 0x487   :  { %1185 = vperm.xlu2 %1856, %v1135_v35  }
 0x489   :  { %1814 = vmatmul.msk.f32.gmra.mxu3 %vm322_vm2, %v2179_v56  ;;  %v1802_v56 = vld [vmem:[%s2991_s7 + $0x130] sm:$0xff] }
 0x48a   :  { %1180 = vperm.xlu1 %1855, %v1134_v29  }
 0x48f   :  { %1200 = vperm.xlu2 %1856, %v1138_v39  }
 0x491   :  { %1815 = vmatmul.msk.f32.gmra.mxu3 %vm322_vm2, %v2190_v58 }
 0x492   :  { %1195 = vperm.xlu1 %1855, %v1137_v30   ;;  %v2619_v30 = vpop.permute.xlu0 %1175 }
 0x497   :  { %1215 = vperm.xlu2 %1856, %v1141_v45   ;;  %v2654_v45 = vld [vmem:[%s2996_s12 + $0x68] sm:$0xff] }
 0x499   :  { %1816 = vmatmul.msk.f32.gmra.mxu3 %vm322_vm2, %v2197_v59  ;;  %v1806_v59 = vld [vmem:[%s2991_s7 + $0x150] sm:$0xff] }
 0x49a   :  { %1210 = vperm.xlu1 %1855, %v1140_v31  }
 0x504   :  { %v960_v28 = vpop.f32.mrf.mxu3 }
 0x505   :  { %v992_v25 = vadd.f32 %v1808_v22, %v960_v28  ;;  %v1127_v22 = vld [vmem:[%s2994_s10 + $0xb8] sm:$0xff] }
 0x507   :  { %v1014_v14 = vmax.f32 %v992_v25, 0.0  ;;  %v1121_v25 = vld [vmem:[%s2994_s10 + $0x88] sm:$0xff] }
 0x50c   :  { %v963_v44 = vpop.f32.mrf.mxu3 }
 0x50d   :  { %v973_v52 = vadd.f32 %v963_v44, %v2203_v62  ;;  %v1800_v62 = vld [vmem:[%s2991_s7 + $0x120] sm:$0xff]  ;;  %v993_v23 = vadd.f32 %v1809_v18, %v963_v44  ;;  %v1126_v18 = vld [vmem:[%s2994_s10 + $0xb0] sm:$0xff] }
 0x50f   :  { %v985_v6 = vadd.f32 %v1805_v63, %v973_v52  ;;  %v1017_v27 = vmax.f32 %v993_v23, 0.0  ;;  %v1109_v23 = vld [vmem:[%s2994_s10 + $0x28] sm:$0xff] }
 0x511   :  { %v1016_v17 = vmax.f32 %v985_v6, 0.0  ;;  %v1150_v6 = vld [vmem:[%s2995_s11 + $0xa8] sm:$0xff] }
 0x514   :  { %v966_v47 = vpop.f32.mrf.mxu3 }
 0x515   :  { %v974_v58 = vadd.f32 %v966_v47, %v2205_v0  ;;  %v972_v0 = vadd.f32 %v960_v28, %v2201_v60  ;;  %v1804_v60 = vld [vmem:[%s2991_s7 + $0x140] sm:$0xff]  ;;  %v994_v19 = vadd.f32 %v1810_v53, %v966_v47  ;;  %s1823_s7 = sld [smem:[#allocation3 + $0x13]]  ;;  %v1125_v53 = vld [vmem:[%s2994_s10 + $0xa8] sm:$0xff] }
 0x517   :  { %v978_v1 = vadd.f32 %v1802_v56, %v974_v58  ;;  %v986_v3 = vadd.f32 %v1806_v59, %v974_v58  ;;  %v976_v10 = vadd.f32 %v1800_v62, %v972_v0  ;;  %v984_v11 = vadd.f32 %v1804_v60, %v972_v0  ;;  %v1104_v62 = vld [vmem:[%s2994_s10] sm:$0xff] }
 0x518   :  { %v1020_v26 = vmax.f32 %v994_v19, 0.0  ;;  %v1097_v0 = vstv %s1820_s19  ;;  %v1116_v60 = vld [vmem:[%s2994_s10 + $0x60] sm:$0xff] }
 0x519   :  { %v1018_v12 = vmax.f32 %v978_v1, 0.0  ;;  %v1019_v13 = vmax.f32 %v986_v3, 0.0  ;;  %v1012_v20 = vmax.f32 %v976_v10, 0.0  ;;  %v1013_v21 = vmax.f32 %v984_v11, 0.0  ;;  %v1124_v10 = vld [vmem:[%s2994_s10 + $0xa0] sm:$0xff]  ;;  %v1106_v11 = vld [vmem:[%s2994_s10 + $0x10] sm:$0xff] }
 0x51a   :  { %v1108_v19 = vld [vmem:[%s2994_s10 + $0x20] sm:$0xff] }
 0x51b   :  { %v1101_v63 = vstv %s1823_s7 }
 0x51c   :  { %v969_v50 = vpop.f32.mrf.mxu3 }
 0x51d   :  { %v975_v55 = vadd.f32 %v969_v50, %v2207_v2  ;;  %v977_v2 = vadd.f32 %v1801_v61, %v973_v52  ;;  %v995_v15 = vadd.f32 %v1811_v9, %v969_v50  ;;  %v1144_v52 = vld [vmem:[%s2995_s11 + $0x78] sm:$0xff]  ;;  %v1099_v61 = vstv %s1822_s20  ;;  %v1117_v9 = vld [vmem:[%s2994_s10 + $0x68] sm:$0xff] }
 0x51e   :  { %1230 = vperm.xlu2 %1856, %v1144_v52   ;;  %v1594_v52 = vsub.f32 1.0, %v2654_v45 }
 0x51f   :  { %v979_v4 = vadd.f32 %v1803_v48, %v975_v55  ;;  %v987_v5 = vadd.f32 %v1807_v49, %v975_v55  ;;  %v1015_v16 = vmax.f32 %v977_v2, 0.0  ;;  %v1023_v24 = vmax.f32 %v995_v15, 0.0  ;;  %v1123_v2 = vld [vmem:[%s2994_s10 + $0x98] sm:$0xff] }
 0x520   :  { %v1094_v49 = vstv %s1821_s17  ;;  %v1107_v15 = vld [vmem:[%s2994_s10 + $0x18] sm:$0xff] }
 0x521   :  { %v1021_v7 = vmax.f32 %v979_v4, 0.0  ;;  %v1022_v8 = vmax.f32 %v987_v5, 0.0 }
 0x523   :  { %1036 = vmatpush.msrb.mxu1 %v1021_v7  ;;  %1056 = vmatpush.msrb.mxu2 %v1022_v8  ;;  %v1105_v7 = vld [vmem:[%s2994_s10 + $0x8] sm:$0xff]  ;;  %v1111_v8 = vld [vmem:[%s2994_s10 + $0x38] sm:$0xff] }
 0x525   :  { %1037 = vmatpush.msrb.mxu1 %v1018_v12  ;;  %1057 = vmatpush.msrb.mxu2 %v1019_v13  ;;  %v1112_v12 = vld [vmem:[%s2994_s10 + $0x40] sm:$0xff]  ;;  %v1118_v13 = vld [vmem:[%s2994_s10 + $0x70] sm:$0xff] }
 0x527   :  { %1038 = vmatpush.msrb.mxu1 %v1015_v16  ;;  %1058 = vmatpush.msrb.mxu2 %v1016_v17  ;;  %v1113_v16 = vld [vmem:[%s2994_s10 + $0x48] sm:$0xff]  ;;  %v1119_v17 = vld [vmem:[%s2994_s10 + $0x78] sm:$0xff] }
 0x529   :  { %1039 = vmatpush.msrb.mxu1 %v1012_v20  ;;  %1059 = vmatpush.msrb.mxu2 %v1013_v21  ;;  %v1114_v20 = vld [vmem:[%s2994_s10 + $0x50] sm:$0xff]  ;;  %v1120_v21 = vld [vmem:[%s2994_s10 + $0x80] sm:$0xff] }
 0x52a   :  { %1817 = vmatmul.msk.f32.vlgmr.msrb.gmra.mxu1 %vm487_vm3, %v2249_v37  ;;  %1818 = vmatmul.msk.f32.vlgmr.msrb.gmra.mxu2 %vm487_vm3, %v2249_v37 }
 0x52b   :  { %1076 = vmatpush.msra.mxu1 %v1023_v24  ;;  %v1115_v24 = vld [vmem:[%s2994_s10 + $0x58] sm:$0xff] }
 0x52d   :  { %1077 = vmatpush.msra.mxu1 %v1020_v26  ;;  %v1122_v26 = vld [vmem:[%s2994_s10 + $0x90] sm:$0xff] }
 0x52f   :  { %1078 = vmatpush.msra.mxu1 %v1017_v27  ;;  %v1156_v27 = vpop.permute.xlu1 %1155 }
 0x531   :  { %1079 = vmatpush.msra.mxu1 %v1014_v14  ;;  %v2615_v14 = vpop.permute.xlu2 %1165 }
 0x532   :  { %1819 = vmatmul.msk.f32.vlgmr.msra.gmra.mxu1 %vm487_vm3, %v2249_v37  ;;  %v1143_v37 = vld [vmem:[%s2995_s11 + $0x70] sm:$0xff] }
 0x533   :  { %1225 = vperm.xlu1 %1855, %v1143_v37   ;;  %v2625_v37 = vpop.permute.xlu0 %1190 }
 0x537   :  { %v2617_v29 = vpop.permute.xlu1 %1160 }
 0x539   :  { %v2621_v31 = vpop.permute.xlu2 %1170 }
 0x53b   :  { %1240 = vperm.xlu1 %1855, %v1146_v34   ;;  %v2629_v35 = vpop.permute.xlu0 %1205 }
 0x53f   :  { %v2623_v32 = vpop.permute.xlu1 %1180 }
 0x541   :  { %v1186_v33 = vpop.permute.xlu2 %1185 }
 0x543   :  { %1255 = vperm.xlu1 %1855, %v1149_v36   ;;  %v2635_v39 = vpop.permute.xlu0 %1220 }
 0x547   :  { %v2627_v34 = vpop.permute.xlu1 %1195 }
 0x549   :  { %v2631_v36 = vpop.permute.xlu2 %1200 }
 0x54b   :  { %1270 = vperm.xlu1 %1855, %v1152_v40  }
 0x551   :  { %v1216_v40 = vpop.permute.xlu2 %1215 }
 0x5a7   :  { %v1041_v38 = vpop.f32.mrf.mxu1 }
 0x5a8   :  { %v1042_v42 = vadd.f32 %v1041_v38, %v2260_v46  ;;  %v2633_v38 = vpop.permute.xlu1 %1210 }
 0x5ad   :  { %v1061_v41 = vpop.f32.mrf.mxu2 }
 0x5ae   :  { %v1062_v28 = vadd.f32 %v1061_v41, %v2260_v46 }
 0x5af   :  { %v1081_v44 = vpop.f32.mrf.mxu1 }
 0x5b0   :  { %v1084_v47 = vsub.f32 %v1042_v42, %v1062_v28  ;;  %v1082_v54 = vadd.f32 %v1081_v44, %v2260_v46  ;;  %v2637_v41 = vpop.permute.xlu1 %1225  ;;  %v2639_v42 = vpop.permute.xlu0 %1235  ;;  %v2649_v44 = vld [vmem:[%s2996_s12 + $0x70] sm:$0xff] }
 0x5b2   :  { %v1085_v56 = vmul.f32 %v1084_v47, %v2264_v51  ;;  %v1087_v58 = vsub.f32 %v1062_v28, %v1082_v54  ;;  %v2644_v28 = vld [vmem:[%s2996_s12 + $0x78] sm:$0xff]  ;;  %v2659_v47 = vld [vmem:[%s2996_s12 + $0x60] sm:$0xff] }
 0x5b4   :  { %v1086_v59 = vadd.f32 %v1085_v56, %v1082_v54  ;;  %v1088_v48 = vmul.f32 %v1087_v58, %v2267_v57  ;;  %v1147_v57 = vld [vmem:[%s2995_s11 + $0x90] sm:$0xff]  ;;  %v2669_v56 = vld [vmem:[%s2996_s12 + $0x48] sm:$0xff]  ;;  %v1596_v58 = vsub.f32 1.0, %v2644_v28 }
 0x5b5   :  { %1245 = vperm.xlu2 %1856, %v1147_v57   ;;  %v2664_v54 = vld [vmem:[%s2996_s12 + $0x50] sm:$0xff]  ;;  %v2693_v57 = vld [vmem:[%s2996_s12 + $0x58] sm:$0xff] }
 0x5b6   :  { %v1089_v50 = vadd.f32 %v1088_v48, %v1086_v59  ;;  %v2675_v59 = vld [vmem:[%s2996_s12 + $0x40] sm:$0xff] }
 0x5b8   :  { %v1095_v55 = vmul.f32 %v1094_v49, %v1089_v50  ;;  %v1102_v3 = vmul.f32 %v1101_v63, %v1089_v50  ;;  %v1595_v50 = vsub.f32 1.0, %v2649_v44  ;;  %v1593_v63 = vsub.f32 1.0, %v2659_v47 }
 0x5ba   :  { %v1096_v46 = vsub.f32 %v2400_v43, %v1095_v55  ;;  %v1110_v43 = vld [vmem:[%s2994_s10 + $0x30] sm:$0xff] }
 0x5bb   :  { %v1539_v55 = vld [vmem:[%s2996_s12 + $0x30] sm:$0xff] }
 0x5bc   :  { %v1098_v51 = vmul.f32 %v1097_v0, %v1096_v46  ;;  %v1533_v0 = vld [vmem:[%s2996_s12] sm:$0xff] }
 0x5bd   :  { %1260 = vperm.xlu2 %1856, %v1150_v6   ;;  %v1587_v6 = vsub.f32 1.0, %v1539_v55 }
 0x5be   :  { %v1100_v1 = vmul.f32 %v1099_v61, %v1098_v51  ;;  %v1591_v51 = vsub.f32 1.0, %v2664_v54 }
 0x5c0   :  { %v1103_v4 = vadd.f32 %v1102_v3, %v1100_v1  ;;  %v1590_v1 = vsub.f32 1.0, %v2669_v56  ;;  %v2688_v3 = vpop.permute.xlu2 %1230 }
 0x5c2   :  { %v1128_v5 = vmul.f32 5.4899807, %v1103_v4  ;;  %v1589_v4 = vsub.f32 1.0, %v2675_v59 }
 0x5c4   :  { %1824 = vmatpush.msk.msrb.mxu0 %vm335_vm1, %v1128_v5  ;;  %1849 = vmatpush.msk.msrb.mxu1 %vm335_vm1, %v1128_v5 }
 0x5c5   :  { %1850 = vmatpush.msk.msra.mxu2 %vm335_vm1, %v1128_v5  ;;  %1851 = vmatpush.msk.msrb.mxu3 %vm335_vm1, %v1128_v5 }
 0x5c6   :  { %1825 = vmatmul.msk.f32.vlgmr.msrb.gmra.mxu0 %vm322_vm2, %v1104_v62  ;;  %1831 = vmatmul.msk.f32.vlgmr.msrb.gmra.mxu1 %vm322_vm2, %v1110_v43  ;;  %v1859_v43 = vld [vmem:[%s2985_s1 + $0xf8] sm:$0xff] }
 0x5c7   :  { %1837 = vmatmul.msk.f32.vlgmr.msra.gmra.mxu2 %vm322_vm2, %v1116_v60  ;;  %1844 = vmatmul.msk.f32.vlgmr.msrb.gmra.mxu3 %vm322_vm2, %v1123_v2  ;;  %v2699_v60 = vmul.f32 %v1859_v43, %v1596_v58  ;;  %v2704_v2 = vld [vmem:[%s2996_s12 + $0x38] sm:$0xff] }
 0x5ce   :  { %1826 = vmatmul.msk.f32.gmra.mxu0 %vm322_vm2, %v1105_v7  ;;  %1832 = vmatmul.msk.f32.gmra.mxu1 %vm322_vm2, %v1111_v8  ;;  %v1581_v7 = vsub.f32 1.0, %v1533_v0  ;;  %v2706_v8 = vpop.permute.xlu1 %1240 }
 0x5cf   :  { %1838 = vmatmul.msk.f32.gmra.mxu2 %vm322_vm2, %v1117_v9  ;;  %1845 = vmatmul.msk.f32.gmra.mxu3 %vm322_vm2, %v1124_v10  ;;  %v1860_v9 = vld [vmem:[%s2985_s1 + $0xe8] sm:$0xff] }
 0x5d0   :  { %v2711_v10 = vmul.f32 %v1860_v9, %v1595_v50  ;;  %v1866_v50 = vld [vmem:[%s2985_s1 + $0x68] sm:$0xff] }
 0x5d6   :  { %1827 = vmatmul.msk.f32.gmra.mxu0 %vm322_vm2, %v1106_v11  ;;  %1833 = vmatmul.msk.f32.gmra.mxu1 %vm322_vm2, %v1112_v12  ;;  %v1861_v11 = vld [vmem:[%s2985_s1 + $0xd8] sm:$0xff] }
 0x5d7   :  { %1839 = vmatmul.msk.f32.gmra.mxu2 %vm322_vm2, %v1118_v13  ;;  %1846 = vmatmul.msk.f32.gmra.mxu3 %vm322_vm2, %v1125_v53  ;;  %v2716_v12 = vmul.f32 %v1861_v11, %v1594_v52  ;;  %v1611_v52 = vmul.f32 %v1866_v50, %v1587_v6 }
 0x5de   :  { %1828 = vmatmul.msk.f32.gmra.mxu0 %vm322_vm2, %v1107_v15  ;;  %1834 = vmatmul.msk.f32.gmra.mxu1 %vm322_vm2, %v1113_v16  ;;  %v1862_v15 = vld [vmem:[%s2985_s1 + $0xc8] sm:$0xff] }
 0x5df   :  { %1840 = vmatmul.msk.f32.gmra.mxu2 %vm322_vm2, %v1119_v17  ;;  %1847 = vmatmul.msk.f32.gmra.mxu3 %vm322_vm2, %v1126_v18  ;;  %v2721_v16 = vmul.f32 %v1862_v15, %v1593_v63  ;;  %v1592_v17 = vsub.f32 1.0, %v2693_v57  ;;  %v1863_v18 = vld [vmem:[%s2985_s1 + $0xa8] sm:$0xff]  ;;  %v2773_v15 = vld [vmem:[%s2996_s12 + $0x10] sm:$0xff] }
 0x5e6   :  { %1829 = vmatmul.msk.f32.gmra.mxu0 %vm322_vm2, %v1108_v19  ;;  %1835 = vmatmul.msk.f32.gmra.mxu1 %vm322_vm2, %v1114_v20  ;;  %v2727_v19 = vmul.f32 %v1863_v18, %v1591_v51  ;;  %v1864_v20 = vld [vmem:[%s2985_s1 + $0x98] sm:$0xff] }
 0x5e7   :  { %1841 = vmatmul.msk.f32.gmra.mxu2 %vm322_vm2, %v1120_v21  ;;  %1848 = vmatmul.msk.f32.gmra.mxu3 %vm322_vm2, %v1127_v22  ;;  %v2732_v21 = vmul.f32 %v1864_v20, %v1590_v1  ;;  %v1251_v22 = vpop.permute.xlu0 %1250 }
 0x5ee   :  { %1830 = vmatmul.msk.f32.gmra.mxu0 %vm322_vm2, %v1109_v23  ;;  %1836 = vmatmul.msk.f32.gmra.mxu1 %vm322_vm2, %v1115_v24  ;;  %v1865_v23 = vld [vmem:[%s2985_s1 + $0x88] sm:$0xff] }
 0x5ef   :  { %1842 = vmatmul.msk.f32.gmra.mxu2 %vm322_vm2, %v1121_v25  ;;  %v2737_v24 = vmul.f32 %v1865_v23, %v1589_v4  ;;  %v1588_v25 = vsub.f32 1.0, %v2704_v2 }
 0x5f7   :  { %1843 = vmatmul.msk.f32.gmra.mxu2 %vm322_vm2, %v1122_v26  ;;  %v2743_v26 = vld [vmem:[%s2996_s12 + $0x98] sm:$0xff] }
 0x5f8   :  { %v1600_v11 = vsub.f32 1.0, %v2743_v26 }
 0x643   :  { %v1365_v48 = vpop.f32.mrf.mxu0  ;;  %v1383_v49 = vpop.f32.mrf.mxu1 }
 0x644   :  { %v1366_v46 = vadd.f32 %v1365_v48, %v1156_v27  ;;  %v1384_v61 = vadd.f32 %v1383_v49, %v1186_v33  ;;  %v2748_v27 = vld [vmem:[%s2996_s12 + $0x8] sm:$0xff] }
 0x646   :  { %v1437_v5 = vmul.f32 0.5, %v1366_v46  ;;  %v1443_v62 = vmul.f32 0.5, %v1384_v61  ;;  %v1867_v46 = vld [vmem:[%s2985_s1 + $0x8] sm:$0xff] }
 0x647   :  { %v1605_v61 = vmul.f32 %v1867_v46, %v1581_v7 }
 0x648   :  { %v1461_v13 = vadd.f32 0.5, %v1437_v5  ;;  %v1467_v53 = vadd.f32 0.5, %v1443_v62  ;;  %v2759_v5 = vld [vmem:[%s2996_s12 + $0xb8] sm:$0xff] }
 0x64a   :  { %v1485_v33 = vmax.f32 %v1461_v13, 0.0  ;;  %v1491_v58 = vmax.f32 %v1467_v53, 0.0  ;;  %v1401_v48 = vpop.f32.mrf.mxu2  ;;  %v1422_v49 = vpop.f32.mrf.mxu3  ;;  %v1582_v13 = vsub.f32 1.0, %v2748_v27  ;;  %v2768_v53 = vld [vmem:[%s2996_s12 + $0xa0] sm:$0xff] }
 0x64b   :  { %v1402_v63 = vadd.f32 %v1401_v48, %v1216_v40  ;;  %v1423_v51 = vadd.f32 %v1422_v49, %v1251_v22  ;;  %v1368_v1 = vpop.f32.mrf.mxu0  ;;  %v1386_v4 = vpop.f32.mrf.mxu1  ;;  %v1868_v22 = vld [vmem:[%s2985_s1 + $0x78] sm:$0xff] }
 0x64c   :  { %v1509_v62 = vmin.f32 %v1485_v33, 1.0  ;;  %v1515_v43 = vmin.f32 %v1491_v58, 1.0  ;;  %v1369_v9 = vadd.f32 %v1368_v1, %v2617_v29  ;;  %v1387_v6 = vadd.f32 %v1386_v4, %v2625_v37  ;;  %v2779_v49 = vpop.permute.xlu2 %1245 }
 0x64d   :  { %v1449_v7 = vmul.f32 0.5, %v1402_v63  ;;  %v1456_v40 = vmul.f32 0.5, %v1423_v51  ;;  %v1612_v23 = vmul.f32 %v1868_v22, %v1588_v25  ;;  %v1604_v33 = vsub.f32 1.0, %v2759_v5  ;;  %v1869_v25 = vld [vmem:[%s2985_s1 + $0x138] sm:$0xff] }
 0x64e   :  { %v1557_v18 = vmul.f32 %v1533_v0, %v1509_v62  ;;  %v1563_v29 = vmul.f32 %v1539_v55, %v1515_v43  ;;  %v1438_v20 = vmul.f32 0.5, %v1369_v9  ;;  %v1444_v37 = vmul.f32 0.5, %v1387_v6  ;;  %v1256_v62 = vpop.permute.xlu1 %1255  ;;  %v1870_v9 = vld [vmem:[%s2985_s1 + $0x18] sm:$0xff] }
 0x64f   :  { %v1473_v58 = vadd.f32 0.5, %v1449_v7  ;;  %v1480_v48 = vadd.f32 0.5, %v1456_v40  ;;  %v1601_v0 = vsub.f32 1.0, %v2768_v53  ;;  %v1583_v55 = vsub.f32 1.0, %v2773_v15 }
 0x650   :  { %v1629_v50 = vadd.f32 %v1605_v61, %v1557_v18  ;;  %v1635_v46 = vadd.f32 %v1611_v52, %v1563_v29  ;;  %v1462_v63 = vadd.f32 0.5, %v1438_v20  ;;  %v1468_v51 = vadd.f32 0.5, %v1444_v37 }
 0x651   :  { %v1497_v1 = vmax.f32 %v1473_v58, 0.0  ;;  %v1504_v4 = vmax.f32 %v1480_v48, 0.0  ;;  %v1624_v43 = vmul.f32 %v1869_v25, %v1600_v11  ;;  %v1606_v61 = vmul.f32 %v1870_v9, %v1582_v13 }
 0x652   :  { %1653 = vst [vmem:[%s2997_s13] sm:$0xff] %v1629_v50  ;;  %v1486_v52 = vmax.f32 %v1462_v63, 0.0  ;;  %v1492_v6 = vmax.f32 %v1468_v51, 0.0  ;;  %v1404_v7 = vpop.f32.mrf.mxu2  ;;  %v1425_v40 = vpop.f32.mrf.mxu3 }
 0x653   :  { %1659 = vst [vmem:[%s2997_s13 + $0x30] sm:$0xff] %v1635_v46  ;;  %v1521_v18 = vmin.f32 %v1497_v1, 1.0  ;;  %v1528_v29 = vmin.f32 %v1504_v4, 1.0  ;;  %v1405_v11 = vadd.f32 %v1404_v7, %v2635_v39  ;;  %v1426_v20 = vadd.f32 %v1425_v40, %v1256_v62  ;;  %v1371_v37 = vpop.f32.mrf.mxu0  ;;  %v1389_v22 = vpop.f32.mrf.mxu1  ;;  %v2803_v46 = vld [vmem:[%s2996_s12 + $0xa8] sm:$0xff]  ;;  %v2808_v39 = vld [vmem:[%s2996_s12 + $0x18] sm:$0xff] }
 0x654   :  { %v1510_v13 = vmin.f32 %v1486_v52, 1.0  ;;  %v1516_v58 = vmin.f32 %v1492_v6, 1.0  ;;  %v1372_v48 = vadd.f32 %v1371_v37, %v2615_v14  ;;  %v1390_v50 = vadd.f32 %v1389_v22, %v2627_v34 }
 0x655   :  { %v1569_v63 = vmul.f32 %v2659_v47, %v1521_v18  ;;  %v1576_v51 = vmul.f32 %v2743_v26, %v1528_v29  ;;  %v1450_v25 = vmul.f32 0.5, %v1405_v11  ;;  %v1457_v9 = vmul.f32 0.5, %v1426_v20  ;;  %v1261_v20 = vpop.permute.xlu2 %1260 }
 0x656   :  { %v1558_v14 = vmul.f32 %v2748_v27, %v1510_v13  ;;  %v1564_v34 = vmul.f32 %v2704_v2, %v1516_v58  ;;  %v1439_v1 = vmul.f32 0.5, %v1372_v48  ;;  %v1445_v47 = vmul.f32 0.5, %v1390_v50 }
 0x657   :  { %v1641_v26 = vadd.f32 %v2721_v16, %v1569_v63  ;;  %v1648_v4 = vadd.f32 %v1624_v43, %v1576_v51  ;;  %v1474_v62 = vadd.f32 0.5, %v1450_v25  ;;  %v1481_v52 = vadd.f32 0.5, %v1457_v9  ;;  %v1871_v16 = vld [vmem:[%s2985_s1 + $0x148] sm:$0xff] }
 0x658   :  { %v1630_v6 = vadd.f32 %v1606_v61, %v1558_v14  ;;  %v1636_v7 = vadd.f32 %v1612_v23, %v1564_v34  ;;  %v1463_v40 = vadd.f32 0.5, %v1439_v1  ;;  %v1469_v18 = vadd.f32 0.5, %v1445_v47  ;;  %v1872_v23 = vld [vmem:[%s2985_s1 + $0x28] sm:$0xff] }
 0x659   :  { %v1602_v29 = vsub.f32 1.0, %v2803_v46  ;;  %v1584_v11 = vsub.f32 1.0, %v2808_v39  ;;  %1665 = vst [vmem:[%s2997_s13 + $0x60] sm:$0xff] %v1641_v26  ;;  %v1498_v2 = vmax.f32 %v1474_v62, 0.0  ;;  %v1505_v27 = vmax.f32 %v1481_v52, 0.0  ;;  %v2846_v62 = vld [vmem:[%s2996_s12 + $0x20] sm:$0xff] }
 0x65a   :  { %v1625_v43 = vmul.f32 %v1871_v16, %v1601_v0  ;;  %v1607_v61 = vmul.f32 %v1872_v23, %v1583_v55  ;;  %1672 = vst [vmem:[%s2997_s13 + $0x98] sm:$0xff] %v1648_v4  ;;  %v1487_v37 = vmax.f32 %v1463_v40, 0.0  ;;  %v1493_v22 = vmax.f32 %v1469_v18, 0.0  ;;  %v1407_v13 = vpop.f32.mrf.mxu2  ;;  %v1428_v58 = vpop.f32.mrf.mxu3 }
 0x65b   :  { %1654 = vst [vmem:[%s2997_s13 + $0x8] sm:$0xff] %v1630_v6  ;;  %v1522_v48 = vmin.f32 %v1498_v2, 1.0  ;;  %v1529_v50 = vmin.f32 %v1505_v27, 1.0  ;;  %v1408_v0 = vadd.f32 %v1407_v13, %v2637_v41  ;;  %v1429_v63 = vadd.f32 %v1428_v58, %v1261_v20  ;;  %v1374_v51 = vpop.f32.mrf.mxu0  ;;  %v1392_v25 = vpop.f32.mrf.mxu1  ;;  %v2841_v41 = vld [vmem:[%s2996_s12 + $0xb0] sm:$0xff] }
 0x65c   :  { %1660 = vst [vmem:[%s2997_s13 + $0x38] sm:$0xff] %v1636_v7  ;;  %v1511_v55 = vmin.f32 %v1487_v37, 1.0  ;;  %v1517_v9 = vmin.f32 %v1493_v22, 1.0  ;;  %v1375_v14 = vadd.f32 %v1374_v51, %v2621_v31  ;;  %v1393_v34 = vadd.f32 %v1392_v25, %v2631_v36  ;;  %v1266_v37 = vpop.permute.xlu0 %1265 }
 0x65d   :  { %v1570_v1 = vmul.f32 %v2654_v45, %v1522_v48  ;;  %v1577_v47 = vmul.f32 %v2768_v53, %v1529_v50  ;;  %v1451_v26 = vmul.f32 0.5, %v1408_v0  ;;  %v1458_v4 = vmul.f32 0.5, %v1429_v63 }
 0x65e   :  { %v1559_v31 = vmul.f32 %v2773_v15, %v1511_v55  ;;  %v1565_v36 = vmul.f32 %v2675_v59, %v1517_v9  ;;  %v1440_v52 = vmul.f32 0.5, %v1375_v14  ;;  %v1446_v45 = vmul.f32 0.5, %v1393_v34 }
 0x65f   :  { %v1642_v53 = vadd.f32 %v2716_v12, %v1570_v1  ;;  %v1649_v6 = vadd.f32 %v1625_v43, %v1577_v47  ;;  %v1475_v7 = vadd.f32 0.5, %v1451_v26  ;;  %v1482_v40 = vadd.f32 0.5, %v1458_v4  ;;  %v1873_v12 = vld [vmem:[%s2985_s1 + $0x158] sm:$0xff] }
 0x660   :  { %v1631_v18 = vadd.f32 %v1607_v61, %v1559_v31  ;;  %v1637_v2 = vadd.f32 %v2737_v24, %v1565_v36  ;;  %v1464_v27 = vadd.f32 0.5, %v1440_v52  ;;  %v1470_v20 = vadd.f32 0.5, %v1446_v45  ;;  %v1874_v24 = vld [vmem:[%s2985_s1 + $0x38] sm:$0xff] }
 0x661   :  { %v1603_v16 = vsub.f32 1.0, %v2841_v41  ;;  %v1585_v23 = vsub.f32 1.0, %v2846_v62  ;;  %1666 = vst [vmem:[%s2997_s13 + $0x68] sm:$0xff] %v1642_v53  ;;  %v1499_v59 = vmax.f32 %v1475_v7, 0.0  ;;  %v1506_v15 = vmax.f32 %v1482_v40, 0.0 }
 0x662   :  { %v1626_v43 = vmul.f32 %v1873_v12, %v1602_v29  ;;  %v1608_v61 = vmul.f32 %v1874_v24, %v1584_v11  ;;  %1673 = vst [vmem:[%s2997_s13 + $0xa0] sm:$0xff] %v1649_v6  ;;  %v1488_v22 = vmax.f32 %v1464_v27, 0.0  ;;  %v1494_v13 = vmax.f32 %v1470_v20, 0.0  ;;  %v1410_v58 = vpop.f32.mrf.mxu2  ;;  %v1431_v48 = vpop.f32.mrf.mxu3 }
 0x663   :  { %1655 = vst [vmem:[%s2997_s13 + $0x10] sm:$0xff] %v1631_v18  ;;  %v1523_v50 = vmin.f32 %v1499_v59, 1.0  ;;  %v1530_v0 = vmin.f32 %v1506_v15, 1.0  ;;  %v1411_v29 = vadd.f32 %v1410_v58, %v2688_v3  ;;  %v1432_v63 = vadd.f32 %v1431_v48, %v1266_v37  ;;  %v1377_v51 = vpop.f32.mrf.mxu0  ;;  %v1395_v25 = vpop.f32.mrf.mxu1  ;;  %v2880_v3 = vld [vmem:[%s2996_s12 + $0x28] sm:$0xff] }
 0x664   :  { %1661 = vst [vmem:[%s2997_s13 + $0x40] sm:$0xff] %v1637_v2  ;;  %v1512_v11 = vmin.f32 %v1488_v22, 1.0  ;;  %v1518_v55 = vmin.f32 %v1494_v13, 1.0  ;;  %v1378_v9 = vadd.f32 %v1377_v51, %v2619_v30  ;;  %v1396_v14 = vadd.f32 %v1395_v25, %v2629_v35  ;;  %v2887_v30 = vld [vmem:[%s2996_s12 + $0x80] sm:$0xff]  ;;  %v1271_v2 = vpop.permute.xlu1 %1270 }
 0x665   :  { %v1571_v34 = vmul.f32 %v2649_v44, %v1523_v50  ;;  %v1578_v1 = vmul.f32 %v2803_v46, %v1530_v0  ;;  %v1452_v47 = vmul.f32 0.5, %v1411_v29  ;;  %v1459_v26 = vmul.f32 0.5, %v1432_v63 }
 0x666   :  { %v1560_v4 = vmul.f32 %v2808_v39, %v1512_v11  ;;  %v1566_v31 = vmul.f32 %v2669_v56, %v1518_v55  ;;  %v1441_v36 = vmul.f32 0.5, %v1378_v9  ;;  %v1447_v52 = vmul.f32 0.5, %v1396_v14  ;;  %v1875_v56 = vld [vmem:[%s2985_s1 + $0x168] sm:$0xff] }
 0x667   :  { %v1643_v35 = vadd.f32 %v2711_v10, %v1571_v34  ;;  %v1650_v44 = vadd.f32 %v1626_v43, %v1578_v1  ;;  %v1476_v46 = vadd.f32 0.5, %v1452_v47  ;;  %v1483_v45 = vadd.f32 0.5, %v1459_v26 }
 0x668   :  { %v1632_v53 = vadd.f32 %v1608_v61, %v1560_v4  ;;  %v1638_v6 = vadd.f32 %v2732_v21, %v1566_v31  ;;  %v1465_v7 = vadd.f32 0.5, %v1441_v36  ;;  %v1471_v40 = vadd.f32 0.5, %v1447_v52  ;;  %v1876_v21 = vld [vmem:[%s2985_s1 + $0x48] sm:$0xff] }
 0x669   :  { %v1586_v39 = vsub.f32 1.0, %v2880_v3  ;;  %v1627_v18 = vmul.f32 %v1875_v56, %v1603_v16  ;;  %1667 = vst [vmem:[%s2997_s13 + $0x70] sm:$0xff] %v1643_v35  ;;  %v1500_v10 = vmax.f32 %v1476_v46, 0.0  ;;  %v1507_v27 = vmax.f32 %v1483_v45, 0.0  ;;  %v1878_v36 = vld [vmem:[%s2985_s1 + $0x108] sm:$0xff]  ;;  %v1879_v46 = vld [vmem:[%s2985_s1 + $0xb8] sm:$0xff] }
 0x66a   :  { %v1609_v20 = vmul.f32 %v1876_v21, %v1585_v23  ;;  %v1597_v37 = vsub.f32 1.0, %v2887_v30  ;;  %1674 = vst [vmem:[%s2997_s13 + $0xa8] sm:$0xff] %v1650_v44  ;;  %v1489_v59 = vmax.f32 %v1465_v7, 0.0  ;;  %v1495_v16 = vmax.f32 %v1471_v40, 0.0  ;;  %v1413_v15 = vpop.f32.mrf.mxu2  ;;  %v1434_v12 = vpop.f32.mrf.mxu3  ;;  %v1550_v7 = vld [vmem:[%s2996_s12 + $0x88] sm:$0xff] }
 0x66b   :  { %1656 = vst [vmem:[%s2997_s13 + $0x18] sm:$0xff] %v1632_v53  ;;  %v1524_v43 = vmin.f32 %v1500_v10, 1.0  ;;  %v1531_v24 = vmin.f32 %v1507_v27, 1.0  ;;  %v1414_v61 = vadd.f32 %v1413_v15, %v2639_v42  ;;  %v1435_v22 = vadd.f32 %v1434_v12, %v1271_v2  ;;  %v1380_v23 = vpop.f32.mrf.mxu0  ;;  %v1398_v13 = vpop.f32.mrf.mxu1  ;;  %v1880_v53 = vld [vmem:[%s2985_s1 + $0x58] sm:$0xff]  ;;  %v1551_v12 = vld [vmem:[%s2996_s12 + $0x90] sm:$0xff] }
 0x66c   :  { %1662 = vst [vmem:[%s2997_s13 + $0x48] sm:$0xff] %v1638_v6  ;;  %v1513_v58 = vmin.f32 %v1489_v59, 1.0  ;;  %v1519_v48 = vmin.f32 %v1495_v16, 1.0  ;;  %v1381_v50 = vadd.f32 %v1380_v23, %v2623_v32  ;;  %v1399_v0 = vadd.f32 %v1398_v13, %v2633_v38 }
 0x66d   :  { %v1572_v29 = vmul.f32 %v2644_v28, %v1524_v43  ;;  %v1579_v63 = vmul.f32 %v2841_v41, %v1531_v24  ;;  %v1453_v51 = vmul.f32 0.5, %v1414_v61  ;;  %v1460_v25 = vmul.f32 0.5, %v1435_v22 }
 0x66e   :  { %v1561_v42 = vmul.f32 %v2846_v62, %v1513_v58  ;;  %v1567_v11 = vmul.f32 %v2664_v54, %v1519_v48  ;;  %v1442_v55 = vmul.f32 0.5, %v1381_v50  ;;  %v1448_v9 = vmul.f32 0.5, %v1399_v0  ;;  %v1877_v54 = vld [vmem:[%s2985_s1 + $0x178] sm:$0xff] }
 0x66f   :  { %v1644_v14 = vadd.f32 %v2699_v60, %v1572_v29  ;;  %v1651_v34 = vadd.f32 %v1627_v18, %v1579_v63  ;;  %v1477_v1 = vadd.f32 0.5, %v1453_v51  ;;  %v1484_v47 = vadd.f32 0.5, %v1460_v25 }
 0x670   :  { %v1633_v32 = vadd.f32 %v1609_v20, %v1561_v42  ;;  %v1639_v38 = vadd.f32 %v2727_v19, %v1567_v11  ;;  %v1466_v26 = vadd.f32 0.5, %v1442_v55  ;;  %v1472_v28 = vadd.f32 0.5, %v1448_v9 }
 0x671   :  { %1668 = vst [vmem:[%s2997_s13 + $0x78] sm:$0xff] %v1644_v14  ;;  %v1501_v41 = vmax.f32 %v1477_v1, 0.0  ;;  %v1508_v62 = vmax.f32 %v1484_v47, 0.0  ;;  %v1628_v60 = vmul.f32 %v1877_v54, %v1604_v33  ;;  %v1621_v52 = vmul.f32 %v1878_v36, %v1597_v37 }
 0x672   :  { %1675 = vst [vmem:[%s2997_s13 + $0xb0] sm:$0xff] %v1651_v34  ;;  %v1490_v19 = vmax.f32 %v1466_v26, 0.0  ;;  %v1496_v4 = vmax.f32 %v1472_v28, 0.0  ;;  %v1416_v31 = vpop.f32.mrf.mxu2  ;;  %v1616_v45 = vmul.f32 %v1879_v46, %v1592_v17  ;;  %v1610_v6 = vmul.f32 %v1880_v53, %v1586_v39 }
 0x673   :  { %1657 = vst [vmem:[%s2997_s13 + $0x20] sm:$0xff] %v1633_v32  ;;  %v1525_v35 = vmin.f32 %v1501_v41, 1.0  ;;  %v1532_v44 = vmin.f32 %v1508_v62, 1.0  ;;  %v1417_v33 = vadd.f32 %v1416_v31, %v2706_v8  ;;  %v1598_v39 = vsub.f32 1.0, %v1550_v7 }
 0x674   :  { %1663 = vst [vmem:[%s2997_s13 + $0x50] sm:$0xff] %v1639_v38  ;;  %v1514_v8 = vmin.f32 %v1490_v19, 1.0  ;;  %v1520_v40 = vmin.f32 %v1496_v4, 1.0  ;;  %v1599_v61 = vsub.f32 1.0, %v1551_v12 }
 0x675   :  { %v1573_v56 = vmul.f32 %v2887_v30, %v1525_v35  ;;  %v1580_v18 = vmul.f32 %v2759_v5, %v1532_v44  ;;  %v1454_v17 = vmul.f32 0.5, %v1417_v33 }
 0x676   :  { %v1562_v2 = vmul.f32 %v2880_v3, %v1514_v8  ;;  %v1568_v10 = vmul.f32 %v2693_v57, %v1520_v40  ;;  %v1881_v57 = vld [vmem:[%s2985_s1 + $0x118] sm:$0xff] }
 0x677   :  { %v1645_v27 = vadd.f32 %v1621_v52, %v1573_v56  ;;  %v1652_v21 = vadd.f32 %v1628_v60, %v1580_v18  ;;  %v1478_v20 = vadd.f32 0.5, %v1454_v17  ;;  %v1622_v3 = vmul.f32 %v1881_v57, %v1598_v39 }
 0x678   :  { %v1634_v37 = vadd.f32 %v1610_v6, %v1562_v2  ;;  %v1640_v59 = vadd.f32 %v1616_v45, %v1568_v10 }
 0x679   :  { %1669 = vst [vmem:[%s2997_s13 + $0x80] sm:$0xff] %v1645_v27  ;;  %v1502_v16 = vmax.f32 %v1478_v20, 0.0 }
 0x67a   :  { %1676 = vst [vmem:[%s2997_s13 + $0xb8] sm:$0xff] %v1652_v21  ;;  %v1419_v5 = vpop.f32.mrf.mxu2 }
 0x67b   :  { %1658 = vst [vmem:[%s2997_s13 + $0x28] sm:$0xff] %v1634_v37  ;;  %v1526_v30 = vmin.f32 %v1502_v16, 1.0  ;;  %v1420_v15 = vadd.f32 %v1419_v5, %v2779_v49  ;;  %v1882_v49 = vld [vmem:[%s2985_s1 + $0x128] sm:$0xff] }
 0x67c   :  { %1664 = vst [vmem:[%s2997_s13 + $0x58] sm:$0xff] %v1640_v59  ;;  %v1623_v58 = vmul.f32 %v1882_v49, %v1599_v61 }
 0x67d   :  { %v1574_v43 = vmul.f32 %v1550_v7, %v1526_v30  ;;  %v1455_v24 = vmul.f32 0.5, %v1420_v15 }
 0x67f   :  { %v1646_v22 = vadd.f32 %v1622_v3, %v1574_v43  ;;  %v1479_v23 = vadd.f32 0.5, %v1455_v24 }
 0x681   :  { %1670 = vst [vmem:[%s2997_s13 + $0x88] sm:$0xff] %v1646_v22  ;;  %v1503_v13 = vmax.f32 %v1479_v23, 0.0 }
 0x683   :  { %v1527_v48 = vmin.f32 %v1503_v13, 1.0 }
 0x685   :  { %v1575_v50 = vmul.f32 %v1551_v12, %v1527_v48 }
 0x687   :  { %v1647_v0 = vadd.f32 %v1623_v58, %v1575_v50 }
 0x689   :  { %1671 = vst [vmem:[%s2997_s13 + $0x90] sm:$0xff] %v1647_v0 }
 0x68a   :  { %1681 = vsyncpa [#allocation4], 1 }

</bundles_post_ra>
